<compile_context>
chip_gen: v7x
topology: tpu7x:2x2x1
jax: 0.10.0
libtpu: 0.0.40
codegen_flags: <defaults>
</compile_context>

<pallas_src>
import math
from functools import partial

import jax
import jax.numpy as jnp
from jax.experimental import pallas as pl
from jax.experimental.pallas import tpu as pltpu


def _cross_attn_kernel(tgt_ref, qpos_ref, mem_ref, pos_ref,
                       wq_ref, wk_ref, wv_ref, wo_ref,
                       bq_ref, bk_ref, bv_ref, bo_ref,
                       lnw_ref, lnb_ref,
                       out_ref,
                       q_sc, m_sc, l_sc, acc_sc,
                       *, nhead: int, ln_eps: float = 1e-5):
    """Grid = (B, num_kv_tiles); kv (reduction) axis is last and 'arbitrary'."""
    f32 = jnp.float32
    cdt = wq_ref.dtype                        # MXU compute dtype (bf16 or f32)
    approx_recip = jnp.dtype(cdt) != jnp.dtype(jnp.float32)
    hd = wq_ref.shape[2]
    scale = 1.0 / math.sqrt(hd)
    kv = pl.program_id(1)

    # ---- kv step 0: project Q once (cached in scratch), init online-softmax state.
    @pl.when(kv == 0)
    def _init():
        # Add positions in the source dtype, cast once for the MXU.
        qin = (tgt_ref[0] + qpos_ref[0]).astype(cdt)          # (Lq, D)
        for h in range(nhead):                                 # static, leading-axis only
            qh = jnp.dot(qin, wq_ref[h], preferred_element_type=f32)
            qh = (qh + bq_ref[h]) * scale                      # scale folded into q once
            q_sc[h] = qh.astype(cdt)                           # (Lq, hd)
        m_sc[...] = jnp.full_like(m_sc, -jnp.inf)
        l_sc[...] = jnp.zeros_like(l_sc)
        acc_sc[...] = jnp.zeros_like(acc_sc)

    # ---- every kv step: project this K/V tile and do one online-softmax update.
    kin = (mem_ref[0] + pos_ref[0]).astype(cdt)                # (kv_blk, D)
    vin = mem_ref[0].astype(cdt)                               # (kv_blk, D)

    dn = (((1,), (1,)), ((), ()))   # contract last dims of q and k: no K transpose
    for h in range(nhead):
        kh = (jnp.dot(kin, wk_ref[h], preferred_element_type=f32) + bk_ref[h]).astype(cdt)
        vh = (jnp.dot(vin, wv_ref[h], preferred_element_type=f32) + bv_ref[h]).astype(cdt)
        s = jax.lax.dot_general(q_sc[h], kh, dn, preferred_element_type=f32)  # (Lq, kv_blk)

        m_prev = m_sc[h]                                       # (Lq, 1) f32
        m_new = jnp.maximum(m_prev, jnp.max(s, axis=-1, keepdims=True))
        alpha = jnp.exp(m_prev - m_new)
        p = jnp.exp(s - m_new)
        l_sc[h] = alpha * l_sc[h] + jnp.sum(p, axis=-1, keepdims=True)
        acc_sc[h] = alpha * acc_sc[h] + jnp.dot(p.astype(cdt), vh,
                                                preferred_element_type=f32)
        m_sc[h] = m_new

    # ---- last kv step: finalize softmax, output projection (accumulated per head,
    #      no lane concat), residual + LayerNorm, single lane-dense store.
    @pl.when(kv == pl.num_programs(1) - 1)
    def _finalize():
        tgt2 = None
        for h in range(nhead):
            o_h = (acc_sc[h] * pl.reciprocal(l_sc[h], approx=approx_recip)).astype(cdt)
            c = jnp.dot(o_h, wo_ref[h], preferred_element_type=f32)   # (Lq, D)
            tgt2 = c if tgt2 is None else tgt2 + c
        x = tgt_ref[0].astype(f32) + tgt2 + bo_ref[...]               # residual (dropout p=0)
        mean = jnp.mean(x, axis=-1, keepdims=True)
        xc = x - mean
        var = jnp.mean(xc * xc, axis=-1, keepdims=True)
        y = xc * jax.lax.rsqrt(var + ln_eps) * lnw_ref[...] + lnb_ref[...]
        out_ref[0] = y.astype(out_ref.dtype)


def _pick_kv_block(lm: int, target: int) -> int:
    """Largest divisor of Lm that is <= target and a multiple of 8 (else Lm)."""
    if lm <= target:
        return lm
    for blk in range(target, 7, -8):
        if lm % blk == 0:
            return blk
    return lm


def cross_attention_layer(tgt_lbd, memory_lbd, query_pos_lbd, pos_lbd, params,
                          nhead: int, compute_dtype=jnp.bfloat16, kv_block: int = 512):
    """Inputs are seq-first (L, B, D) as in PyTorch; returns (L, B, D)."""
    # (L, B, D) -> (B, L, D)
    tgt = jnp.transpose(tgt_lbd, (1, 0, 2))
    mem = jnp.transpose(memory_lbd, (1, 0, 2))
    qpos = jnp.transpose(query_pos_lbd, (1, 0, 2))
    pos = jnp.transpose(pos_lbd, (1, 0, 2))

    B, Lq, D = tgt.shape
    Lm = mem.shape[1]
    assert D % nhead == 0
    hd = D // nhead

    kv_blk = _pick_kv_block(Lm, kv_block)
    n_kv = Lm // kv_blk

    # Per-head packed projection weights:  x @ wq3[h]  ==  (x @ Wq^T)[:, h*hd:(h+1)*hd]
    def per_head_in(w):  # torch weight (D, D)
        return jnp.transpose(w.T.reshape(D, nhead, hd), (1, 0, 2)).astype(compute_dtype)

    wq3 = per_head_in(params["wq"])                       # (H, D, hd)
    wk3 = per_head_in(params["wk"])
    wv3 = per_head_in(params["wv"])
    wo3 = params["wo"].T.reshape(nhead, hd, D).astype(compute_dtype)   # (H, hd, D)

    bq3 = params["bq"].reshape(nhead, 1, hd).astype(jnp.float32)
    bk3 = params["bk"].reshape(nhead, 1, hd).astype(jnp.float32)
    bv3 = params["bv"].reshape(nhead, 1, hd).astype(jnp.float32)
    bo2 = params["bo"].reshape(1, D).astype(jnp.float32)
    lnw = params["ln_w"].reshape(1, D).astype(jnp.float32)
    lnb = params["ln_b"].reshape(1, D).astype(jnp.float32)

    q_side = pl.BlockSpec((1, Lq, D), lambda b, k: (b, 0, 0))
    kv_side = pl.BlockSpec((1, kv_blk, D), lambda b, k: (b, k, 0))
    w_in = pl.BlockSpec((nhead, D, hd), lambda b, k: (0, 0, 0))
    w_out = pl.BlockSpec((nhead, hd, D), lambda b, k: (0, 0, 0))
    b_in = pl.BlockSpec((nhead, 1, hd), lambda b, k: (0, 0, 0))
    vec_d = pl.BlockSpec((1, D), lambda b, k: (0, 0))

    out = pl.pallas_call(
        partial(_cross_attn_kernel, nhead=nhead),
        out_shape=jax.ShapeDtypeStruct((B, Lq, D), tgt.dtype),
        grid_spec=pltpu.PrefetchScalarGridSpec(
            num_scalar_prefetch=0,
            grid=(B, n_kv),
            in_specs=[
                q_side,            # tgt
                q_side,            # query_pos
                kv_side,           # memory (streamed over kv tiles)
                kv_side,           # pos    (streamed over kv tiles)
                w_in, w_in, w_in,  # Wq / Wk / Wv packed per head
                w_out,             # Wo packed per head
                b_in, b_in, b_in,  # bq / bk / bv per head
                vec_d,             # bo
                vec_d,             # ln weight
                vec_d,             # ln bias
            ],
            out_specs=q_side,
            scratch_shapes=[
                pltpu.VMEM((nhead, Lq, hd), compute_dtype),   # cached scaled Q
                pltpu.VMEM((nhead, Lq, 1), jnp.float32),      # running max
                pltpu.VMEM((nhead, Lq, 1), jnp.float32),      # running sum
                pltpu.VMEM((nhead, Lq, hd), jnp.float32),     # running output numerator
            ],
        ),
        compiler_params=pltpu.CompilerParams(
            dimension_semantics=("parallel", "arbitrary")),
    )(tgt, qpos, mem, pos, wq3, wk3, wv3, wo3, bq3, bk3, bv3, bo2, lnw, lnb)

    # (B, L, D) -> (L, B, D)
    return jnp.transpose(out, (1, 0, 2))


# ---------------- pure-JAX reference (for correctness check) ----------------
def reference_forward(tgt, mem, qpos, pos, params, nhead):
    D = tgt.shape[-1]
    hd = D // nhead
    q = (tgt + qpos) @ params["wq"].T + params["bq"]
    k = (mem + pos) @ params["wk"].T + params["bk"]
    v = mem @ params["wv"].T + params["bv"]

    def heads(x):  # (L, B, D) -> (B, H, L, hd)
        L, B, _ = x.shape
        return jnp.transpose(x.reshape(L, B, nhead, hd), (1, 2, 0, 3))

    qh, kh, vh = heads(q), heads(k), heads(v)
    scores = jnp.einsum("bhqd,bhkd->bhqk", qh, kh) / math.sqrt(hd)
    p = jax.nn.softmax(scores, axis=-1)
    o = jnp.einsum("bhqk,bhkd->bhqd", p, vh)                 # (B, H, Lq, hd)
    o = jnp.transpose(o, (2, 0, 1, 3)).reshape(tgt.shape)    # (Lq, B, D)
    tgt2 = o @ params["wo"].T + params["bo"]
    x = tgt + tgt2
    mean = jnp.mean(x, axis=-1, keepdims=True)
    var = jnp.mean((x - mean) ** 2, axis=-1, keepdims=True)
    return (x - mean) * jax.lax.rsqrt(var + 1e-5) * params["ln_w"] + params["ln_b"]


def xavier_uniform(key, shape):
    fan_out, fan_in = shape
    bound = math.sqrt(6.0 / (fan_in + fan_out))
    return jax.random.uniform(key, shape, jnp.float32, -bound, bound)


if __name__ == "__main__":
    # Small shapes: d_model=32, nhead=4, Lq (queries)=8, Lm (memory tokens)=16, batch=2.
    d_model, nhead = 32, 4
    Lq, Lm, B = 8, 16, 2

    key = jax.random.PRNGKey(0)
    keys = jax.random.split(key, 8)

    # MultiheadAttention in_proj_weight (3D, D) split into Wq/Wk/Wv; biases zero
    # (matches nn.MultiheadAttention._reset_parameters + xavier on dim>1 params).
    in_proj = xavier_uniform(keys[0], (3 * d_model, d_model))
    params = {
        "wq": in_proj[:d_model],
        "wk": in_proj[d_model:2 * d_model],
        "wv": in_proj[2 * d_model:],
        "bq": jnp.zeros((d_model,), jnp.float32),
        "bk": jnp.zeros((d_model,), jnp.float32),
        "bv": jnp.zeros((d_model,), jnp.float32),
        "wo": xavier_uniform(keys[1], (d_model, d_model)),
        "bo": jnp.zeros((d_model,), jnp.float32),
        "ln_w": jnp.ones((d_model,), jnp.float32),
        "ln_b": jnp.zeros((d_model,), jnp.float32),
    }

    # Inputs in PyTorch seq-first convention: (L, B, d_model).
    tgt = jax.random.normal(keys[2], (Lq, B, d_model), jnp.float32)
    memory = jax.random.normal(keys[3], (Lm, B, d_model), jnp.float32)
    query_pos = jax.random.normal(keys[4], (Lq, B, d_model), jnp.float32)
    pos = jax.random.normal(keys[5], (Lm, B, d_model), jnp.float32)

    ref = reference_forward(tgt, memory, query_pos, pos, params, nhead)

    # Performance path: bf16 MXU operands, f32 accumulation, kv_block=8 so the
    # online-softmax accumulation runs over 2 memory tiles.  Loosened tolerance
    # per bf16 rounding of matmul operands.
    out_bf16 = cross_attention_layer(tgt, memory, query_pos, pos, params, nhead,
                                     compute_dtype=jnp.bfloat16, kv_block=8)
    out_bf16 = jax.block_until_ready(out_bf16)
    assert out_bf16.shape == (Lq, B, d_model)
    assert jnp.allclose(out_bf16, ref, atol=4e-2, rtol=4e-2), \
        "bf16 kernel mismatch vs JAX reference"

    # Strict-accuracy path: f32 compute dtype, exact reciprocal — must match to 1e-4.
    out_f32 = cross_attention_layer(tgt, memory, query_pos, pos, params, nhead,
                                    compute_dtype=jnp.float32, kv_block=8)
    out_f32 = jax.block_until_ready(out_f32)
    assert jnp.allclose(out_f32, ref, atol=1e-4, rtol=1e-4), \
        "f32 kernel mismatch vs JAX reference"

    print("KERNEL_OK")
</pallas_src>

<mosaic_0001>
module attributes {stable_mosaic.version = 11 : i64} {
  func.func @_cross_attn_kernel(%arg0: i32, %arg1: i32, %arg2: memref<1x8x32xf32, #tpu.memory_space<vmem>>, %arg3: memref<1x8x32xf32, #tpu.memory_space<vmem>>, %arg4: memref<1x8x32xf32, #tpu.memory_space<vmem>>, %arg5: memref<1x8x32xf32, #tpu.memory_space<vmem>>, %arg6: memref<4x32x8xbf16, #tpu.memory_space<vmem>>, %arg7: memref<4x32x8xbf16, #tpu.memory_space<vmem>>, %arg8: memref<4x32x8xbf16, #tpu.memory_space<vmem>>, %arg9: memref<4x8x32xbf16, #tpu.memory_space<vmem>>, %arg10: memref<4x1x8xf32, #tpu.memory_space<vmem>>, %arg11: memref<4x1x8xf32, #tpu.memory_space<vmem>>, %arg12: memref<4x1x8xf32, #tpu.memory_space<vmem>>, %arg13: memref<1x32xf32, #tpu.memory_space<vmem>>, %arg14: memref<1x32xf32, #tpu.memory_space<vmem>>, %arg15: memref<1x32xf32, #tpu.memory_space<vmem>>, %arg16: memref<1x8x32xf32, #tpu.memory_space<vmem>>, %arg17: memref<4x8x8xbf16, #tpu.memory_space<vmem>>, %arg18: memref<4x8x1xf32, #tpu.memory_space<vmem>>, %arg19: memref<4x8x1xf32, #tpu.memory_space<vmem>>, %arg20: memref<4x8x8xf32, #tpu.memory_space<vmem>>) attributes {dimension_semantics = [#tpu.dimension_semantics<parallel>, #tpu.dimension_semantics<arbitrary>], iteration_bounds = array<i64: 2, 2>, scalar_prefetch = 0 : i64, scratch_operands = 4 : i64, tpu.core_type = #tpu.core_type<tc>, window_params = [{transform_indices = @transform_0, window_bounds = array<i64: 1, 8, 32>}, {transform_indices = @transform_1, window_bounds = array<i64: 1, 8, 32>}, {transform_indices = @transform_2, window_bounds = array<i64: 1, 8, 32>}, {transform_indices = @transform_3, window_bounds = array<i64: 1, 8, 32>}, {pipeline_mode = #tpu.pipeline_mode<synchronous>, transform_indices = @transform_4, window_bounds = array<i64: 4, 32, 8>}, {pipeline_mode = #tpu.pipeline_mode<synchronous>, transform_indices = @transform_5, window_bounds = array<i64: 4, 32, 8>}, {pipeline_mode = #tpu.pipeline_mode<synchronous>, transform_indices = @transform_6, window_bounds = array<i64: 4, 32, 8>}, {pipeline_mode = #tpu.pipeline_mode<synchronous>, transform_indices = @transform_7, window_bounds = array<i64: 4, 8, 32>}, {pipeline_mode = #tpu.pipeline_mode<synchronous>, transform_indices = @transform_8, window_bounds = array<i64: 4, 1, 8>}, {pipeline_mode = #tpu.pipeline_mode<synchronous>, transform_indices = @transform_9, window_bounds = array<i64: 4, 1, 8>}, {pipeline_mode = #tpu.pipeline_mode<synchronous>, transform_indices = @transform_10, window_bounds = array<i64: 4, 1, 8>}, {pipeline_mode = #tpu.pipeline_mode<synchronous>, transform_indices = @transform_11, window_bounds = array<i64: 1, 32>}, {pipeline_mode = #tpu.pipeline_mode<synchronous>, transform_indices = @transform_12, window_bounds = array<i64: 1, 32>}, {pipeline_mode = #tpu.pipeline_mode<synchronous>, transform_indices = @transform_13, window_bounds = array<i64: 1, 32>}, {transform_indices = @transform_14, window_bounds = array<i64: 1, 8, 32>}]} {
    %c0_i32 = arith.constant 0 : i32
    %0 = arith.cmpi eq, %arg1, %c0_i32 : i32
    %1 = arith.extui %0 : i1 to i32
    %c0_i32_0 = arith.constant 0 : i32
    %2 = arith.cmpi ne, %1, %c0_i32_0 : i32
    scf.if %2 {
      %c0_162 = arith.constant 0 : index
      %c0_163 = arith.constant 0 : index
      %c0_164 = arith.constant 0 : index
      %219 = vector.load %arg2[%c0_162, %c0_163, %c0_164] : memref<1x8x32xf32, #tpu.memory_space<vmem>>, vector<1x8x32xf32>
      %220 = vector.shape_cast %219 : vector<1x8x32xf32> to vector<8x32xf32>
      %c0_165 = arith.constant 0 : index
      %c0_166 = arith.constant 0 : index
      %c0_167 = arith.constant 0 : index
      %221 = vector.load %arg3[%c0_165, %c0_166, %c0_167] : memref<1x8x32xf32, #tpu.memory_space<vmem>>, vector<1x8x32xf32>
      %222 = vector.shape_cast %221 : vector<1x8x32xf32> to vector<8x32xf32>
      %223 = arith.addf %220, %222 : vector<8x32xf32>
      %224 = arith.truncf %223 : vector<8x32xf32> to vector<8x32xbf16>
      %c0_168 = arith.constant 0 : index
      %c0_169 = arith.constant 0 : index
      %c0_170 = arith.constant 0 : index
      %225 = vector.load %arg6[%c0_168, %c0_169, %c0_170] : memref<4x32x8xbf16, #tpu.memory_space<vmem>>, vector<1x32x8xbf16>
      %226 = vector.shape_cast %225 : vector<1x32x8xbf16> to vector<32x8xbf16>
      %cst_171 = arith.constant dense<0.000000e+00> : vector<8x8xf32>
      %227 = tpu.matmul %224, %226, %cst_171 {dimension_numbers = #tpu.dot_dimension_numbers<[1], [0], [0], [1], [0, 0, 1, 1], [], []>} : vector<8x32xbf16>, vector<32x8xbf16>, vector<8x8xf32> -> vector<8x8xf32>
      %c0_172 = arith.constant 0 : index
      %c0_173 = arith.constant 0 : index
      %c0_174 = arith.constant 0 : index
      %228 = vector.load %arg10[%c0_172, %c0_173, %c0_174] : memref<4x1x8xf32, #tpu.memory_space<vmem>>, vector<1x1x8xf32>
      %229 = vector.shape_cast %228 : vector<1x1x8xf32> to vector<1x8xf32>
      %230 = vector.broadcast %229 : vector<1x8xf32> to vector<8x8xf32>
      %231 = arith.addf %227, %230 : vector<8x8xf32>
      %cst_175 = arith.constant 0.353553385 : f32
      %232 = vector.broadcast %cst_175 : f32 to vector<8x8xf32>
      %233 = arith.mulf %231, %232 : vector<8x8xf32>
      %234 = arith.truncf %233 : vector<8x8xf32> to vector<8x8xbf16>
      %c0_176 = arith.constant 0 : index
      %c0_177 = arith.constant 0 : index
      %c0_178 = arith.constant 0 : index
      %235 = vector.load %arg17[%c0_176, %c0_177, %c0_178] : memref<4x8x8xbf16, #tpu.memory_space<vmem>>, vector<1x8x8xbf16>
      %236 = vector.shape_cast %235 : vector<1x8x8xbf16> to vector<8x8xbf16>
      %237 = vector.shape_cast %234 : vector<8x8xbf16> to vector<1x8x8xbf16>
      tpu.vector_store %arg17[%c0_176, %c0_177, %c0_178], %237 {strides = array<i32>} : memref<4x8x8xbf16, #tpu.memory_space<vmem>>, vector<1x8x8xbf16>,
      %c1_179 = arith.constant 1 : index
      %c0_180 = arith.constant 0 : index
      %c0_181 = arith.constant 0 : index
      %238 = vector.load %arg6[%c1_179, %c0_180, %c0_181] : memref<4x32x8xbf16, #tpu.memory_space<vmem>>, vector<1x32x8xbf16>
      %239 = vector.shape_cast %238 : vector<1x32x8xbf16> to vector<32x8xbf16>
      %cst_182 = arith.constant dense<0.000000e+00> : vector<8x8xf32>
      %240 = tpu.matmul %224, %239, %cst_182 {dimension_numbers = #tpu.dot_dimension_numbers<[1], [0], [0], [1], [0, 0, 1, 1], [], []>} : vector<8x32xbf16>, vector<32x8xbf16>, vector<8x8xf32> -> vector<8x8xf32>
      %c1_183 = arith.constant 1 : index
      %c0_184 = arith.constant 0 : index
      %c0_185 = arith.constant 0 : index
      %241 = vector.load %arg10[%c1_183, %c0_184, %c0_185] : memref<4x1x8xf32, #tpu.memory_space<vmem>>, vector<1x1x8xf32>
      %242 = vector.shape_cast %241 : vector<1x1x8xf32> to vector<1x8xf32>
      %243 = vector.broadcast %242 : vector<1x8xf32> to vector<8x8xf32>
      %244 = arith.addf %240, %243 : vector<8x8xf32>
      %cst_186 = arith.constant 0.353553385 : f32
      %245 = vector.broadcast %cst_186 : f32 to vector<8x8xf32>
      %246 = arith.mulf %244, %245 : vector<8x8xf32>
      %247 = arith.truncf %246 : vector<8x8xf32> to vector<8x8xbf16>
      %c1_187 = arith.constant 1 : index
      %c0_188 = arith.constant 0 : index
      %c0_189 = arith.constant 0 : index
      %248 = vector.load %arg17[%c1_187, %c0_188, %c0_189] : memref<4x8x8xbf16, #tpu.memory_space<vmem>>, vector<1x8x8xbf16>
      %249 = vector.shape_cast %248 : vector<1x8x8xbf16> to vector<8x8xbf16>
      %250 = vector.shape_cast %247 : vector<8x8xbf16> to vector<1x8x8xbf16>
      tpu.vector_store %arg17[%c1_187, %c0_188, %c0_189], %250 {strides = array<i32>} : memref<4x8x8xbf16, #tpu.memory_space<vmem>>, vector<1x8x8xbf16>,
      %c2_190 = arith.constant 2 : index
      %c0_191 = arith.constant 0 : index
      %c0_192 = arith.constant 0 : index
      %251 = vector.load %arg6[%c2_190, %c0_191, %c0_192] : memref<4x32x8xbf16, #tpu.memory_space<vmem>>, vector<1x32x8xbf16>
      %252 = vector.shape_cast %251 : vector<1x32x8xbf16> to vector<32x8xbf16>
      %cst_193 = arith.constant dense<0.000000e+00> : vector<8x8xf32>
      %253 = tpu.matmul %224, %252, %cst_193 {dimension_numbers = #tpu.dot_dimension_numbers<[1], [0], [0], [1], [0, 0, 1, 1], [], []>} : vector<8x32xbf16>, vector<32x8xbf16>, vector<8x8xf32> -> vector<8x8xf32>
      %c2_194 = arith.constant 2 : index
      %c0_195 = arith.constant 0 : index
      %c0_196 = arith.constant 0 : index
      %254 = vector.load %arg10[%c2_194, %c0_195, %c0_196] : memref<4x1x8xf32, #tpu.memory_space<vmem>>, vector<1x1x8xf32>
      %255 = vector.shape_cast %254 : vector<1x1x8xf32> to vector<1x8xf32>
      %256 = vector.broadcast %255 : vector<1x8xf32> to vector<8x8xf32>
      %257 = arith.addf %253, %256 : vector<8x8xf32>
      %cst_197 = arith.constant 0.353553385 : f32
      %258 = vector.broadcast %cst_197 : f32 to vector<8x8xf32>
      %259 = arith.mulf %257, %258 : vector<8x8xf32>
      %260 = arith.truncf %259 : vector<8x8xf32> to vector<8x8xbf16>
      %c2_198 = arith.constant 2 : index
      %c0_199 = arith.constant 0 : index
      %c0_200 = arith.constant 0 : index
      %261 = vector.load %arg17[%c2_198, %c0_199, %c0_200] : memref<4x8x8xbf16, #tpu.memory_space<vmem>>, vector<1x8x8xbf16>
      %262 = vector.shape_cast %261 : vector<1x8x8xbf16> to vector<8x8xbf16>
      %263 = vector.shape_cast %260 : vector<8x8xbf16> to vector<1x8x8xbf16>
      tpu.vector_store %arg17[%c2_198, %c0_199, %c0_200], %263 {strides = array<i32>} : memref<4x8x8xbf16, #tpu.memory_space<vmem>>, vector<1x8x8xbf16>,
      %c3_201 = arith.constant 3 : index
      %c0_202 = arith.constant 0 : index
      %c0_203 = arith.constant 0 : index
      %264 = vector.load %arg6[%c3_201, %c0_202, %c0_203] : memref<4x32x8xbf16, #tpu.memory_space<vmem>>, vector<1x32x8xbf16>
      %265 = vector.shape_cast %264 : vector<1x32x8xbf16> to vector<32x8xbf16>
      %cst_204 = arith.constant dense<0.000000e+00> : vector<8x8xf32>
      %266 = tpu.matmul %224, %265, %cst_204 {dimension_numbers = #tpu.dot_dimension_numbers<[1], [0], [0], [1], [0, 0, 1, 1], [], []>} : vector<8x32xbf16>, vector<32x8xbf16>, vector<8x8xf32> -> vector<8x8xf32>
      %c3_205 = arith.constant 3 : index
      %c0_206 = arith.constant 0 : index
      %c0_207 = arith.constant 0 : index
      %267 = vector.load %arg10[%c3_205, %c0_206, %c0_207] : memref<4x1x8xf32, #tpu.memory_space<vmem>>, vector<1x1x8xf32>
      %268 = vector.shape_cast %267 : vector<1x1x8xf32> to vector<1x8xf32>
      %269 = vector.broadcast %268 : vector<1x8xf32> to vector<8x8xf32>
      %270 = arith.addf %266, %269 : vector<8x8xf32>
      %cst_208 = arith.constant 0.353553385 : f32
      %271 = vector.broadcast %cst_208 : f32 to vector<8x8xf32>
      %272 = arith.mulf %270, %271 : vector<8x8xf32>
      %273 = arith.truncf %272 : vector<8x8xf32> to vector<8x8xbf16>
      %c3_209 = arith.constant 3 : index
      %c0_210 = arith.constant 0 : index
      %c0_211 = arith.constant 0 : index
      %274 = vector.load %arg17[%c3_209, %c0_210, %c0_211] : memref<4x8x8xbf16, #tpu.memory_space<vmem>>, vector<1x8x8xbf16>
      %275 = vector.shape_cast %274 : vector<1x8x8xbf16> to vector<8x8xbf16>
      %276 = vector.shape_cast %273 : vector<8x8xbf16> to vector<1x8x8xbf16>
      tpu.vector_store %arg17[%c3_209, %c0_210, %c0_211], %276 {strides = array<i32>} : memref<4x8x8xbf16, #tpu.memory_space<vmem>>, vector<1x8x8xbf16>,
      %cst_212 = arith.constant 0xFF800000 : f32
      %277 = vector.broadcast %cst_212 : f32 to vector<4x8x1xf32>
      %c0_213 = arith.constant 0 : index
      %c0_214 = arith.constant 0 : index
      %c0_215 = arith.constant 0 : index
      %278 = vector.load %arg18[%c0_213, %c0_214, %c0_215] : memref<4x8x1xf32, #tpu.memory_space<vmem>>, vector<4x8x1xf32>
      tpu.vector_store %arg18[%c0_213, %c0_214, %c0_215], %277 {strides = array<i32>} : memref<4x8x1xf32, #tpu.memory_space<vmem>>, vector<4x8x1xf32>,
      %cst_216 = arith.constant 0.000000e+00 : f32
      %279 = vector.broadcast %cst_216 : f32 to vector<4x8x1xf32>
      %c0_217 = arith.constant 0 : index
      %c0_218 = arith.constant 0 : index
      %c0_219 = arith.constant 0 : index
      %280 = vector.load %arg19[%c0_217, %c0_218, %c0_219] : memref<4x8x1xf32, #tpu.memory_space<vmem>>, vector<4x8x1xf32>
      tpu.vector_store %arg19[%c0_217, %c0_218, %c0_219], %279 {strides = array<i32>} : memref<4x8x1xf32, #tpu.memory_space<vmem>>, vector<4x8x1xf32>,
      %cst_220 = arith.constant 0.000000e+00 : f32
      %281 = vector.broadcast %cst_220 : f32 to vector<4x8x8xf32>
      %c0_221 = arith.constant 0 : index
      %c0_222 = arith.constant 0 : index
      %c0_223 = arith.constant 0 : index
      %282 = vector.load %arg20[%c0_221, %c0_222, %c0_223] : memref<4x8x8xf32, #tpu.memory_space<vmem>>, vector<4x8x8xf32>
      tpu.vector_store %arg20[%c0_221, %c0_222, %c0_223], %281 {strides = array<i32>} : memref<4x8x8xf32, #tpu.memory_space<vmem>>, vector<4x8x8xf32>,
    } else {
    }
    %c0 = arith.constant 0 : index
    %c0_1 = arith.constant 0 : index
    %c0_2 = arith.constant 0 : index
    %3 = vector.load %arg4[%c0, %c0_1, %c0_2] : memref<1x8x32xf32, #tpu.memory_space<vmem>>, vector<1x8x32xf32>
    %4 = vector.shape_cast %3 : vector<1x8x32xf32> to vector<8x32xf32>
    %c0_3 = arith.constant 0 : index
    %c0_4 = arith.constant 0 : index
    %c0_5 = arith.constant 0 : index
    %5 = vector.load %arg5[%c0_3, %c0_4, %c0_5] : memref<1x8x32xf32, #tpu.memory_space<vmem>>, vector<1x8x32xf32>
    %6 = vector.shape_cast %5 : vector<1x8x32xf32> to vector<8x32xf32>
    %7 = arith.addf %4, %6 : vector<8x32xf32>
    %8 = arith.truncf %7 : vector<8x32xf32> to vector<8x32xbf16>
    %c0_6 = arith.constant 0 : index
    %c0_7 = arith.constant 0 : index
    %c0_8 = arith.constant 0 : index
    %9 = vector.load %arg4[%c0_6, %c0_7, %c0_8] : memref<1x8x32xf32, #tpu.memory_space<vmem>>, vector<1x8x32xf32>
    %10 = vector.shape_cast %9 : vector<1x8x32xf32> to vector<8x32xf32>
    %11 = arith.truncf %10 : vector<8x32xf32> to vector<8x32xbf16>
    %c0_9 = arith.constant 0 : index
    %c0_10 = arith.constant 0 : index
    %c0_11 = arith.constant 0 : index
    %12 = vector.load %arg7[%c0_9, %c0_10, %c0_11] : memref<4x32x8xbf16, #tpu.memory_space<vmem>>, vector<1x32x8xbf16>
    %13 = vector.shape_cast %12 : vector<1x32x8xbf16> to vector<32x8xbf16>
    %cst = arith.constant dense<0.000000e+00> : vector<8x8xf32>
    %14 = tpu.matmul %8, %13, %cst {dimension_numbers = #tpu.dot_dimension_numbers<[1], [0], [0], [1], [0, 0, 1, 1], [], []>} : vector<8x32xbf16>, vector<32x8xbf16>, vector<8x8xf32> -> vector<8x8xf32>
    %c0_12 = arith.constant 0 : index
    %c0_13 = arith.constant 0 : index
    %c0_14 = arith.constant 0 : index
    %15 = vector.load %arg11[%c0_12, %c0_13, %c0_14] : memref<4x1x8xf32, #tpu.memory_space<vmem>>, vector<1x1x8xf32>
    %16 = vector.shape_cast %15 : vector<1x1x8xf32> to vector<1x8xf32>
    %17 = vector.broadcast %16 : vector<1x8xf32> to vector<8x8xf32>
    %18 = arith.addf %14, %17 : vector<8x8xf32>
    %19 = arith.truncf %18 : vector<8x8xf32> to vector<8x8xbf16>
    %c0_15 = arith.constant 0 : index
    %c0_16 = arith.constant 0 : index
    %c0_17 = arith.constant 0 : index
    %20 = vector.load %arg8[%c0_15, %c0_16, %c0_17] : memref<4x32x8xbf16, #tpu.memory_space<vmem>>, vector<1x32x8xbf16>
    %21 = vector.shape_cast %20 : vector<1x32x8xbf16> to vector<32x8xbf16>
    %cst_18 = arith.constant dense<0.000000e+00> : vector<8x8xf32>
    %22 = tpu.matmul %11, %21, %cst_18 {dimension_numbers = #tpu.dot_dimension_numbers<[1], [0], [0], [1], [0, 0, 1, 1], [], []>} : vector<8x32xbf16>, vector<32x8xbf16>, vector<8x8xf32> -> vector<8x8xf32>
    %c0_19 = arith.constant 0 : index
    %c0_20 = arith.constant 0 : index
    %c0_21 = arith.constant 0 : index
    %23 = vector.load %arg12[%c0_19, %c0_20, %c0_21] : memref<4x1x8xf32, #tpu.memory_space<vmem>>, vector<1x1x8xf32>
    %24 = vector.shape_cast %23 : vector<1x1x8xf32> to vector<1x8xf32>
    %25 = vector.broadcast %24 : vector<1x8xf32> to vector<8x8xf32>
    %26 = arith.addf %22, %25 : vector<8x8xf32>
    %27 = arith.truncf %26 : vector<8x8xf32> to vector<8x8xbf16>
    %c0_22 = arith.constant 0 : index
    %c0_23 = arith.constant 0 : index
    %c0_24 = arith.constant 0 : index
    %28 = vector.load %arg17[%c0_22, %c0_23, %c0_24] : memref<4x8x8xbf16, #tpu.memory_space<vmem>>, vector<1x8x8xbf16>
    %29 = vector.shape_cast %28 : vector<1x8x8xbf16> to vector<8x8xbf16>
    %cst_25 = arith.constant dense<0.000000e+00> : vector<8x8xf32>
    %30 = tpu.matmul %29, %19, %cst_25 {dimension_numbers = #tpu.dot_dimension_numbers<[1], [1], [0], [0], [0, 0, 1, 0], [], []>} : vector<8x8xbf16>, vector<8x8xbf16>, vector<8x8xf32> -> vector<8x8xf32>
    %c0_26 = arith.constant 0 : index
    %c0_27 = arith.constant 0 : index
    %c0_28 = arith.constant 0 : index
    %31 = vector.load %arg18[%c0_26, %c0_27, %c0_28] : memref<4x8x1xf32, #tpu.memory_space<vmem>>, vector<1x8x1xf32>
    %32 = vector.shape_cast %31 : vector<1x8x1xf32> to vector<8x1xf32>
    %cst_29 = arith.constant dense<0xFF800000> : vector<8xf32>
    %33 = vector.multi_reduction <maximumf>, %30, %cst_29 [1] : vector<8x8xf32> to vector<8xf32>
    %34 = vector.shape_cast %33 : vector<8xf32> to vector<8x1xf32>
    %35 = arith.maximumf %32, %34 : vector<8x1xf32>
    %36 = arith.subf %32, %35 : vector<8x1xf32>
    %37 = math.exp %36 : vector<8x1xf32>
    %38 = vector.broadcast %35 : vector<8x1xf32> to vector<8x8xf32>
    %39 = arith.subf %30, %38 : vector<8x8xf32>
    %40 = math.exp %39 : vector<8x8xf32>
    %c0_30 = arith.constant 0 : index
    %c0_31 = arith.constant 0 : index
    %c0_32 = arith.constant 0 : index
    %41 = vector.load %arg19[%c0_30, %c0_31, %c0_32] : memref<4x8x1xf32, #tpu.memory_space<vmem>>, vector<1x8x1xf32>
    %42 = vector.shape_cast %41 : vector<1x8x1xf32> to vector<8x1xf32>
    %43 = arith.mulf %37, %42 : vector<8x1xf32>
    %cst_33 = arith.constant dense<0.000000e+00> : vector<8xf32>
    %44 = vector.multi_reduction <add>, %40, %cst_33 [1] : vector<8x8xf32> to vector<8xf32>
    %45 = vector.shape_cast %44 : vector<8xf32> to vector<8x1xf32>
    %46 = arith.addf %43, %45 : vector<8x1xf32>
    %c0_34 = arith.constant 0 : index
    %c0_35 = arith.constant 0 : index
    %c0_36 = arith.constant 0 : index
    %47 = vector.load %arg19[%c0_34, %c0_35, %c0_36] : memref<4x8x1xf32, #tpu.memory_space<vmem>>, vector<1x8x1xf32>
    %48 = vector.shape_cast %47 : vector<1x8x1xf32> to vector<8x1xf32>
    %49 = vector.shape_cast %46 : vector<8x1xf32> to vector<1x8x1xf32>
    tpu.vector_store %arg19[%c0_34, %c0_35, %c0_36], %49 {strides = array<i32>} : memref<4x8x1xf32, #tpu.memory_space<vmem>>, vector<1x8x1xf32>,
    %c0_37 = arith.constant 0 : index
    %c0_38 = arith.constant 0 : index
    %c0_39 = arith.constant 0 : index
    %50 = vector.load %arg20[%c0_37, %c0_38, %c0_39] : memref<4x8x8xf32, #tpu.memory_space<vmem>>, vector<1x8x8xf32>
    %51 = vector.shape_cast %50 : vector<1x8x8xf32> to vector<8x8xf32>
    %52 = vector.broadcast %37 : vector<8x1xf32> to vector<8x8xf32>
    %53 = arith.mulf %52, %51 : vector<8x8xf32>
    %54 = arith.truncf %40 : vector<8x8xf32> to vector<8x8xbf16>
    %cst_40 = arith.constant dense<0.000000e+00> : vector<8x8xf32>
    %55 = tpu.matmul %54, %27, %cst_40 {dimension_numbers = #tpu.dot_dimension_numbers<[1], [0], [0], [1], [0, 0, 1, 1], [], []>} : vector<8x8xbf16>, vector<8x8xbf16>, vector<8x8xf32> -> vector<8x8xf32>
    %56 = arith.addf %53, %55 : vector<8x8xf32>
    %c0_41 = arith.constant 0 : index
    %c0_42 = arith.constant 0 : index
    %c0_43 = arith.constant 0 : index
    %57 = vector.load %arg20[%c0_41, %c0_42, %c0_43] : memref<4x8x8xf32, #tpu.memory_space<vmem>>, vector<1x8x8xf32>
    %58 = vector.shape_cast %57 : vector<1x8x8xf32> to vector<8x8xf32>
    %59 = vector.shape_cast %56 : vector<8x8xf32> to vector<1x8x8xf32>
    tpu.vector_store %arg20[%c0_41, %c0_42, %c0_43], %59 {strides = array<i32>} : memref<4x8x8xf32, #tpu.memory_space<vmem>>, vector<1x8x8xf32>,
    %c0_44 = arith.constant 0 : index
    %c0_45 = arith.constant 0 : index
    %c0_46 = arith.constant 0 : index
    %60 = vector.load %arg18[%c0_44, %c0_45, %c0_46] : memref<4x8x1xf32, #tpu.memory_space<vmem>>, vector<1x8x1xf32>
    %61 = vector.shape_cast %60 : vector<1x8x1xf32> to vector<8x1xf32>
    %62 = vector.shape_cast %35 : vector<8x1xf32> to vector<1x8x1xf32>
    tpu.vector_store %arg18[%c0_44, %c0_45, %c0_46], %62 {strides = array<i32>} : memref<4x8x1xf32, #tpu.memory_space<vmem>>, vector<1x8x1xf32>,
    %c1 = arith.constant 1 : index
    %c0_47 = arith.constant 0 : index
    %c0_48 = arith.constant 0 : index
    %63 = vector.load %arg7[%c1, %c0_47, %c0_48] : memref<4x32x8xbf16, #tpu.memory_space<vmem>>, vector<1x32x8xbf16>
    %64 = vector.shape_cast %63 : vector<1x32x8xbf16> to vector<32x8xbf16>
    %cst_49 = arith.constant dense<0.000000e+00> : vector<8x8xf32>
    %65 = tpu.matmul %8, %64, %cst_49 {dimension_numbers = #tpu.dot_dimension_numbers<[1], [0], [0], [1], [0, 0, 1, 1], [], []>} : vector<8x32xbf16>, vector<32x8xbf16>, vector<8x8xf32> -> vector<8x8xf32>
    %c1_50 = arith.constant 1 : index
    %c0_51 = arith.constant 0 : index
    %c0_52 = arith.constant 0 : index
    %66 = vector.load %arg11[%c1_50, %c0_51, %c0_52] : memref<4x1x8xf32, #tpu.memory_space<vmem>>, vector<1x1x8xf32>
    %67 = vector.shape_cast %66 : vector<1x1x8xf32> to vector<1x8xf32>
    %68 = vector.broadcast %67 : vector<1x8xf32> to vector<8x8xf32>
    %69 = arith.addf %65, %68 : vector<8x8xf32>
    %70 = arith.truncf %69 : vector<8x8xf32> to vector<8x8xbf16>
    %c1_53 = arith.constant 1 : index
    %c0_54 = arith.constant 0 : index
    %c0_55 = arith.constant 0 : index
    %71 = vector.load %arg8[%c1_53, %c0_54, %c0_55] : memref<4x32x8xbf16, #tpu.memory_space<vmem>>, vector<1x32x8xbf16>
    %72 = vector.shape_cast %71 : vector<1x32x8xbf16> to vector<32x8xbf16>
    %cst_56 = arith.constant dense<0.000000e+00> : vector<8x8xf32>
    %73 = tpu.matmul %11, %72, %cst_56 {dimension_numbers = #tpu.dot_dimension_numbers<[1], [0], [0], [1], [0, 0, 1, 1], [], []>} : vector<8x32xbf16>, vector<32x8xbf16>, vector<8x8xf32> -> vector<8x8xf32>
    %c1_57 = arith.constant 1 : index
    %c0_58 = arith.constant 0 : index
    %c0_59 = arith.constant 0 : index
    %74 = vector.load %arg12[%c1_57, %c0_58, %c0_59] : memref<4x1x8xf32, #tpu.memory_space<vmem>>, vector<1x1x8xf32>
    %75 = vector.shape_cast %74 : vector<1x1x8xf32> to vector<1x8xf32>
    %76 = vector.broadcast %75 : vector<1x8xf32> to vector<8x8xf32>
    %77 = arith.addf %73, %76 : vector<8x8xf32>
    %78 = arith.truncf %77 : vector<8x8xf32> to vector<8x8xbf16>
    %c1_60 = arith.constant 1 : index
    %c0_61 = arith.constant 0 : index
    %c0_62 = arith.constant 0 : index
    %79 = vector.load %arg17[%c1_60, %c0_61, %c0_62] : memref<4x8x8xbf16, #tpu.memory_space<vmem>>, vector<1x8x8xbf16>
    %80 = vector.shape_cast %79 : vector<1x8x8xbf16> to vector<8x8xbf16>
    %cst_63 = arith.constant dense<0.000000e+00> : vector<8x8xf32>
    %81 = tpu.matmul %80, %70, %cst_63 {dimension_numbers = #tpu.dot_dimension_numbers<[1], [1], [0], [0], [0, 0, 1, 0], [], []>} : vector<8x8xbf16>, vector<8x8xbf16>, vector<8x8xf32> -> vector<8x8xf32>
    %c1_64 = arith.constant 1 : index
    %c0_65 = arith.constant 0 : index
    %c0_66 = arith.constant 0 : index
    %82 = vector.load %arg18[%c1_64, %c0_65, %c0_66] : memref<4x8x1xf32, #tpu.memory_space<vmem>>, vector<1x8x1xf32>
    %83 = vector.shape_cast %82 : vector<1x8x1xf32> to vector<8x1xf32>
    %cst_67 = arith.constant dense<0xFF800000> : vector<8xf32>
    %84 = vector.multi_reduction <maximumf>, %81, %cst_67 [1] : vector<8x8xf32> to vector<8xf32>
    %85 = vector.shape_cast %84 : vector<8xf32> to vector<8x1xf32>
    %86 = arith.maximumf %83, %85 : vector<8x1xf32>
    %87 = arith.subf %83, %86 : vector<8x1xf32>
    %88 = math.exp %87 : vector<8x1xf32>
    %89 = vector.broadcast %86 : vector<8x1xf32> to vector<8x8xf32>
    %90 = arith.subf %81, %89 : vector<8x8xf32>
    %91 = math.exp %90 : vector<8x8xf32>
    %c1_68 = arith.constant 1 : index
    %c0_69 = arith.constant 0 : index
    %c0_70 = arith.constant 0 : index
    %92 = vector.load %arg19[%c1_68, %c0_69, %c0_70] : memref<4x8x1xf32, #tpu.memory_space<vmem>>, vector<1x8x1xf32>
    %93 = vector.shape_cast %92 : vector<1x8x1xf32> to vector<8x1xf32>
    %94 = arith.mulf %88, %93 : vector<8x1xf32>
    %cst_71 = arith.constant dense<0.000000e+00> : vector<8xf32>
    %95 = vector.multi_reduction <add>, %91, %cst_71 [1] : vector<8x8xf32> to vector<8xf32>
    %96 = vector.shape_cast %95 : vector<8xf32> to vector<8x1xf32>
    %97 = arith.addf %94, %96 : vector<8x1xf32>
    %c1_72 = arith.constant 1 : index
    %c0_73 = arith.constant 0 : index
    %c0_74 = arith.constant 0 : index
    %98 = vector.load %arg19[%c1_72, %c0_73, %c0_74] : memref<4x8x1xf32, #tpu.memory_space<vmem>>, vector<1x8x1xf32>
    %99 = vector.shape_cast %98 : vector<1x8x1xf32> to vector<8x1xf32>
    %100 = vector.shape_cast %97 : vector<8x1xf32> to vector<1x8x1xf32>
    tpu.vector_store %arg19[%c1_72, %c0_73, %c0_74], %100 {strides = array<i32>} : memref<4x8x1xf32, #tpu.memory_space<vmem>>, vector<1x8x1xf32>,
    %c1_75 = arith.constant 1 : index
    %c0_76 = arith.constant 0 : index
    %c0_77 = arith.constant 0 : index
    %101 = vector.load %arg20[%c1_75, %c0_76, %c0_77] : memref<4x8x8xf32, #tpu.memory_space<vmem>>, vector<1x8x8xf32>
    %102 = vector.shape_cast %101 : vector<1x8x8xf32> to vector<8x8xf32>
    %103 = vector.broadcast %88 : vector<8x1xf32> to vector<8x8xf32>
    %104 = arith.mulf %103, %102 : vector<8x8xf32>
    %105 = arith.truncf %91 : vector<8x8xf32> to vector<8x8xbf16>
    %cst_78 = arith.constant dense<0.000000e+00> : vector<8x8xf32>
    %106 = tpu.matmul %105, %78, %cst_78 {dimension_numbers = #tpu.dot_dimension_numbers<[1], [0], [0], [1], [0, 0, 1, 1], [], []>} : vector<8x8xbf16>, vector<8x8xbf16>, vector<8x8xf32> -> vector<8x8xf32>
    %107 = arith.addf %104, %106 : vector<8x8xf32>
    %c1_79 = arith.constant 1 : index
    %c0_80 = arith.constant 0 : index
    %c0_81 = arith.constant 0 : index
    %108 = vector.load %arg20[%c1_79, %c0_80, %c0_81] : memref<4x8x8xf32, #tpu.memory_space<vmem>>, vector<1x8x8xf32>
    %109 = vector.shape_cast %108 : vector<1x8x8xf32> to vector<8x8xf32>
    %110 = vector.shape_cast %107 : vector<8x8xf32> to vector<1x8x8xf32>
    tpu.vector_store %arg20[%c1_79, %c0_80, %c0_81], %110 {strides = array<i32>} : memref<4x8x8xf32, #tpu.memory_space<vmem>>, vector<1x8x8xf32>,
    %c1_82 = arith.constant 1 : index
    %c0_83 = arith.constant 0 : index
    %c0_84 = arith.constant 0 : index
    %111 = vector.load %arg18[%c1_82, %c0_83, %c0_84] : memref<4x8x1xf32, #tpu.memory_space<vmem>>, vector<1x8x1xf32>
    %112 = vector.shape_cast %111 : vector<1x8x1xf32> to vector<8x1xf32>
    %113 = vector.shape_cast %86 : vector<8x1xf32> to vector<1x8x1xf32>
    tpu.vector_store %arg18[%c1_82, %c0_83, %c0_84], %113 {strides = array<i32>} : memref<4x8x1xf32, #tpu.memory_space<vmem>>, vector<1x8x1xf32>,
    %c2 = arith.constant 2 : index
    %c0_85 = arith.constant 0 : index
    %c0_86 = arith.constant 0 : index
    %114 = vector.load %arg7[%c2, %c0_85, %c0_86] : memref<4x32x8xbf16, #tpu.memory_space<vmem>>, vector<1x32x8xbf16>
    %115 = vector.shape_cast %114 : vector<1x32x8xbf16> to vector<32x8xbf16>
    %cst_87 = arith.constant dense<0.000000e+00> : vector<8x8xf32>
    %116 = tpu.matmul %8, %115, %cst_87 {dimension_numbers = #tpu.dot_dimension_numbers<[1], [0], [0], [1], [0, 0, 1, 1], [], []>} : vector<8x32xbf16>, vector<32x8xbf16>, vector<8x8xf32> -> vector<8x8xf32>
    %c2_88 = arith.constant 2 : index
    %c0_89 = arith.constant 0 : index
    %c0_90 = arith.constant 0 : index
    %117 = vector.load %arg11[%c2_88, %c0_89, %c0_90] : memref<4x1x8xf32, #tpu.memory_space<vmem>>, vector<1x1x8xf32>
    %118 = vector.shape_cast %117 : vector<1x1x8xf32> to vector<1x8xf32>
    %119 = vector.broadcast %118 : vector<1x8xf32> to vector<8x8xf32>
    %120 = arith.addf %116, %119 : vector<8x8xf32>
    %121 = arith.truncf %120 : vector<8x8xf32> to vector<8x8xbf16>
    %c2_91 = arith.constant 2 : index
    %c0_92 = arith.constant 0 : index
    %c0_93 = arith.constant 0 : index
    %122 = vector.load %arg8[%c2_91, %c0_92, %c0_93] : memref<4x32x8xbf16, #tpu.memory_space<vmem>>, vector<1x32x8xbf16>
    %123 = vector.shape_cast %122 : vector<1x32x8xbf16> to vector<32x8xbf16>
    %cst_94 = arith.constant dense<0.000000e+00> : vector<8x8xf32>
    %124 = tpu.matmul %11, %123, %cst_94 {dimension_numbers = #tpu.dot_dimension_numbers<[1], [0], [0], [1], [0, 0, 1, 1], [], []>} : vector<8x32xbf16>, vector<32x8xbf16>, vector<8x8xf32> -> vector<8x8xf32>
    %c2_95 = arith.constant 2 : index
    %c0_96 = arith.constant 0 : index
    %c0_97 = arith.constant 0 : index
    %125 = vector.load %arg12[%c2_95, %c0_96, %c0_97] : memref<4x1x8xf32, #tpu.memory_space<vmem>>, vector<1x1x8xf32>
    %126 = vector.shape_cast %125 : vector<1x1x8xf32> to vector<1x8xf32>
    %127 = vector.broadcast %126 : vector<1x8xf32> to vector<8x8xf32>
    %128 = arith.addf %124, %127 : vector<8x8xf32>
    %129 = arith.truncf %128 : vector<8x8xf32> to vector<8x8xbf16>
    %c2_98 = arith.constant 2 : index
    %c0_99 = arith.constant 0 : index
    %c0_100 = arith.constant 0 : index
    %130 = vector.load %arg17[%c2_98, %c0_99, %c0_100] : memref<4x8x8xbf16, #tpu.memory_space<vmem>>, vector<1x8x8xbf16>
    %131 = vector.shape_cast %130 : vector<1x8x8xbf16> to vector<8x8xbf16>
    %cst_101 = arith.constant dense<0.000000e+00> : vector<8x8xf32>
    %132 = tpu.matmul %131, %121, %cst_101 {dimension_numbers = #tpu.dot_dimension_numbers<[1], [1], [0], [0], [0, 0, 1, 0], [], []>} : vector<8x8xbf16>, vector<8x8xbf16>, vector<8x8xf32> -> vector<8x8xf32>
    %c2_102 = arith.constant 2 : index
    %c0_103 = arith.constant 0 : index
    %c0_104 = arith.constant 0 : index
    %133 = vector.load %arg18[%c2_102, %c0_103, %c0_104] : memref<4x8x1xf32, #tpu.memory_space<vmem>>, vector<1x8x1xf32>
    %134 = vector.shape_cast %133 : vector<1x8x1xf32> to vector<8x1xf32>
    %cst_105 = arith.constant dense<0xFF800000> : vector<8xf32>
    %135 = vector.multi_reduction <maximumf>, %132, %cst_105 [1] : vector<8x8xf32> to vector<8xf32>
    %136 = vector.shape_cast %135 : vector<8xf32> to vector<8x1xf32>
    %137 = arith.maximumf %134, %136 : vector<8x1xf32>
    %138 = arith.subf %134, %137 : vector<8x1xf32>
    %139 = math.exp %138 : vector<8x1xf32>
    %140 = vector.broadcast %137 : vector<8x1xf32> to vector<8x8xf32>
    %141 = arith.subf %132, %140 : vector<8x8xf32>
    %142 = math.exp %141 : vector<8x8xf32>
    %c2_106 = arith.constant 2 : index
    %c0_107 = arith.constant 0 : index
    %c0_108 = arith.constant 0 : index
    %143 = vector.load %arg19[%c2_106, %c0_107, %c0_108] : memref<4x8x1xf32, #tpu.memory_space<vmem>>, vector<1x8x1xf32>
    %144 = vector.shape_cast %143 : vector<1x8x1xf32> to vector<8x1xf32>
    %145 = arith.mulf %139, %144 : vector<8x1xf32>
    %cst_109 = arith.constant dense<0.000000e+00> : vector<8xf32>
    %146 = vector.multi_reduction <add>, %142, %cst_109 [1] : vector<8x8xf32> to vector<8xf32>
    %147 = vector.shape_cast %146 : vector<8xf32> to vector<8x1xf32>
    %148 = arith.addf %145, %147 : vector<8x1xf32>
    %c2_110 = arith.constant 2 : index
    %c0_111 = arith.constant 0 : index
    %c0_112 = arith.constant 0 : index
    %149 = vector.load %arg19[%c2_110, %c0_111, %c0_112] : memref<4x8x1xf32, #tpu.memory_space<vmem>>, vector<1x8x1xf32>
    %150 = vector.shape_cast %149 : vector<1x8x1xf32> to vector<8x1xf32>
    %151 = vector.shape_cast %148 : vector<8x1xf32> to vector<1x8x1xf32>
    tpu.vector_store %arg19[%c2_110, %c0_111, %c0_112], %151 {strides = array<i32>} : memref<4x8x1xf32, #tpu.memory_space<vmem>>, vector<1x8x1xf32>,
    %c2_113 = arith.constant 2 : index
    %c0_114 = arith.constant 0 : index
    %c0_115 = arith.constant 0 : index
    %152 = vector.load %arg20[%c2_113, %c0_114, %c0_115] : memref<4x8x8xf32, #tpu.memory_space<vmem>>, vector<1x8x8xf32>
    %153 = vector.shape_cast %152 : vector<1x8x8xf32> to vector<8x8xf32>
    %154 = vector.broadcast %139 : vector<8x1xf32> to vector<8x8xf32>
    %155 = arith.mulf %154, %153 : vector<8x8xf32>
    %156 = arith.truncf %142 : vector<8x8xf32> to vector<8x8xbf16>
    %cst_116 = arith.constant dense<0.000000e+00> : vector<8x8xf32>
    %157 = tpu.matmul %156, %129, %cst_116 {dimension_numbers = #tpu.dot_dimension_numbers<[1], [0], [0], [1], [0, 0, 1, 1], [], []>} : vector<8x8xbf16>, vector<8x8xbf16>, vector<8x8xf32> -> vector<8x8xf32>
    %158 = arith.addf %155, %157 : vector<8x8xf32>
    %c2_117 = arith.constant 2 : index
    %c0_118 = arith.constant 0 : index
    %c0_119 = arith.constant 0 : index
    %159 = vector.load %arg20[%c2_117, %c0_118, %c0_119] : memref<4x8x8xf32, #tpu.memory_space<vmem>>, vector<1x8x8xf32>
    %160 = vector.shape_cast %159 : vector<1x8x8xf32> to vector<8x8xf32>
    %161 = vector.shape_cast %158 : vector<8x8xf32> to vector<1x8x8xf32>
    tpu.vector_store %arg20[%c2_117, %c0_118, %c0_119], %161 {strides = array<i32>} : memref<4x8x8xf32, #tpu.memory_space<vmem>>, vector<1x8x8xf32>,
    %c2_120 = arith.constant 2 : index
    %c0_121 = arith.constant 0 : index
    %c0_122 = arith.constant 0 : index
    %162 = vector.load %arg18[%c2_120, %c0_121, %c0_122] : memref<4x8x1xf32, #tpu.memory_space<vmem>>, vector<1x8x1xf32>
    %163 = vector.shape_cast %162 : vector<1x8x1xf32> to vector<8x1xf32>
    %164 = vector.shape_cast %137 : vector<8x1xf32> to vector<1x8x1xf32>
    tpu.vector_store %arg18[%c2_120, %c0_121, %c0_122], %164 {strides = array<i32>} : memref<4x8x1xf32, #tpu.memory_space<vmem>>, vector<1x8x1xf32>,
    %c3 = arith.constant 3 : index
    %c0_123 = arith.constant 0 : index
    %c0_124 = arith.constant 0 : index
    %165 = vector.load %arg7[%c3, %c0_123, %c0_124] : memref<4x32x8xbf16, #tpu.memory_space<vmem>>, vector<1x32x8xbf16>
    %166 = vector.shape_cast %165 : vector<1x32x8xbf16> to vector<32x8xbf16>
    %cst_125 = arith.constant dense<0.000000e+00> : vector<8x8xf32>
    %167 = tpu.matmul %8, %166, %cst_125 {dimension_numbers = #tpu.dot_dimension_numbers<[1], [0], [0], [1], [0, 0, 1, 1], [], []>} : vector<8x32xbf16>, vector<32x8xbf16>, vector<8x8xf32> -> vector<8x8xf32>
    %c3_126 = arith.constant 3 : index
    %c0_127 = arith.constant 0 : index
    %c0_128 = arith.constant 0 : index
    %168 = vector.load %arg11[%c3_126, %c0_127, %c0_128] : memref<4x1x8xf32, #tpu.memory_space<vmem>>, vector<1x1x8xf32>
    %169 = vector.shape_cast %168 : vector<1x1x8xf32> to vector<1x8xf32>
    %170 = vector.broadcast %169 : vector<1x8xf32> to vector<8x8xf32>
    %171 = arith.addf %167, %170 : vector<8x8xf32>
    %172 = arith.truncf %171 : vector<8x8xf32> to vector<8x8xbf16>
    %c3_129 = arith.constant 3 : index
    %c0_130 = arith.constant 0 : index
    %c0_131 = arith.constant 0 : index
    %173 = vector.load %arg8[%c3_129, %c0_130, %c0_131] : memref<4x32x8xbf16, #tpu.memory_space<vmem>>, vector<1x32x8xbf16>
    %174 = vector.shape_cast %173 : vector<1x32x8xbf16> to vector<32x8xbf16>
    %cst_132 = arith.constant dense<0.000000e+00> : vector<8x8xf32>
    %175 = tpu.matmul %11, %174, %cst_132 {dimension_numbers = #tpu.dot_dimension_numbers<[1], [0], [0], [1], [0, 0, 1, 1], [], []>} : vector<8x32xbf16>, vector<32x8xbf16>, vector<8x8xf32> -> vector<8x8xf32>
    %c3_133 = arith.constant 3 : index
    %c0_134 = arith.constant 0 : index
    %c0_135 = arith.constant 0 : index
    %176 = vector.load %arg12[%c3_133, %c0_134, %c0_135] : memref<4x1x8xf32, #tpu.memory_space<vmem>>, vector<1x1x8xf32>
    %177 = vector.shape_cast %176 : vector<1x1x8xf32> to vector<1x8xf32>
    %178 = vector.broadcast %177 : vector<1x8xf32> to vector<8x8xf32>
    %179 = arith.addf %175, %178 : vector<8x8xf32>
    %180 = arith.truncf %179 : vector<8x8xf32> to vector<8x8xbf16>
    %c3_136 = arith.constant 3 : index
    %c0_137 = arith.constant 0 : index
    %c0_138 = arith.constant 0 : index
    %181 = vector.load %arg17[%c3_136, %c0_137, %c0_138] : memref<4x8x8xbf16, #tpu.memory_space<vmem>>, vector<1x8x8xbf16>
    %182 = vector.shape_cast %181 : vector<1x8x8xbf16> to vector<8x8xbf16>
    %cst_139 = arith.constant dense<0.000000e+00> : vector<8x8xf32>
    %183 = tpu.matmul %182, %172, %cst_139 {dimension_numbers = #tpu.dot_dimension_numbers<[1], [1], [0], [0], [0, 0, 1, 0], [], []>} : vector<8x8xbf16>, vector<8x8xbf16>, vector<8x8xf32> -> vector<8x8xf32>
    %c3_140 = arith.constant 3 : index
    %c0_141 = arith.constant 0 : index
    %c0_142 = arith.constant 0 : index
    %184 = vector.load %arg18[%c3_140, %c0_141, %c0_142] : memref<4x8x1xf32, #tpu.memory_space<vmem>>, vector<1x8x1xf32>
    %185 = vector.shape_cast %184 : vector<1x8x1xf32> to vector<8x1xf32>
    %cst_143 = arith.constant dense<0xFF800000> : vector<8xf32>
    %186 = vector.multi_reduction <maximumf>, %183, %cst_143 [1] : vector<8x8xf32> to vector<8xf32>
    %187 = vector.shape_cast %186 : vector<8xf32> to vector<8x1xf32>
    %188 = arith.maximumf %185, %187 : vector<8x1xf32>
    %189 = arith.subf %185, %188 : vector<8x1xf32>
    %190 = math.exp %189 : vector<8x1xf32>
    %191 = vector.broadcast %188 : vector<8x1xf32> to vector<8x8xf32>
    %192 = arith.subf %183, %191 : vector<8x8xf32>
    %193 = math.exp %192 : vector<8x8xf32>
    %c3_144 = arith.constant 3 : index
    %c0_145 = arith.constant 0 : index
    %c0_146 = arith.constant 0 : index
    %194 = vector.load %arg19[%c3_144, %c0_145, %c0_146] : memref<4x8x1xf32, #tpu.memory_space<vmem>>, vector<1x8x1xf32>
    %195 = vector.shape_cast %194 : vector<1x8x1xf32> to vector<8x1xf32>
    %196 = arith.mulf %190, %195 : vector<8x1xf32>
    %cst_147 = arith.constant dense<0.000000e+00> : vector<8xf32>
    %197 = vector.multi_reduction <add>, %193, %cst_147 [1] : vector<8x8xf32> to vector<8xf32>
    %198 = vector.shape_cast %197 : vector<8xf32> to vector<8x1xf32>
    %199 = arith.addf %196, %198 : vector<8x1xf32>
    %c3_148 = arith.constant 3 : index
    %c0_149 = arith.constant 0 : index
    %c0_150 = arith.constant 0 : index
    %200 = vector.load %arg19[%c3_148, %c0_149, %c0_150] : memref<4x8x1xf32, #tpu.memory_space<vmem>>, vector<1x8x1xf32>
    %201 = vector.shape_cast %200 : vector<1x8x1xf32> to vector<8x1xf32>
    %202 = vector.shape_cast %199 : vector<8x1xf32> to vector<1x8x1xf32>
    tpu.vector_store %arg19[%c3_148, %c0_149, %c0_150], %202 {strides = array<i32>} : memref<4x8x1xf32, #tpu.memory_space<vmem>>, vector<1x8x1xf32>,
    %c3_151 = arith.constant 3 : index
    %c0_152 = arith.constant 0 : index
    %c0_153 = arith.constant 0 : index
    %203 = vector.load %arg20[%c3_151, %c0_152, %c0_153] : memref<4x8x8xf32, #tpu.memory_space<vmem>>, vector<1x8x8xf32>
    %204 = vector.shape_cast %203 : vector<1x8x8xf32> to vector<8x8xf32>
    %205 = vector.broadcast %190 : vector<8x1xf32> to vector<8x8xf32>
    %206 = arith.mulf %205, %204 : vector<8x8xf32>
    %207 = arith.truncf %193 : vector<8x8xf32> to vector<8x8xbf16>
    %cst_154 = arith.constant dense<0.000000e+00> : vector<8x8xf32>
    %208 = tpu.matmul %207, %180, %cst_154 {dimension_numbers = #tpu.dot_dimension_numbers<[1], [0], [0], [1], [0, 0, 1, 1], [], []>} : vector<8x8xbf16>, vector<8x8xbf16>, vector<8x8xf32> -> vector<8x8xf32>
    %209 = arith.addf %206, %208 : vector<8x8xf32>
    %c3_155 = arith.constant 3 : index
    %c0_156 = arith.constant 0 : index
    %c0_157 = arith.constant 0 : index
    %210 = vector.load %arg20[%c3_155, %c0_156, %c0_157] : memref<4x8x8xf32, #tpu.memory_space<vmem>>, vector<1x8x8xf32>
    %211 = vector.shape_cast %210 : vector<1x8x8xf32> to vector<8x8xf32>
    %212 = vector.shape_cast %209 : vector<8x8xf32> to vector<1x8x8xf32>
    tpu.vector_store %arg20[%c3_155, %c0_156, %c0_157], %212 {strides = array<i32>} : memref<4x8x8xf32, #tpu.memory_space<vmem>>, vector<1x8x8xf32>,
    %c3_158 = arith.constant 3 : index
    %c0_159 = arith.constant 0 : index
    %c0_160 = arith.constant 0 : index
    %213 = vector.load %arg18[%c3_158, %c0_159, %c0_160] : memref<4x8x1xf32, #tpu.memory_space<vmem>>, vector<1x8x1xf32>
    %214 = vector.shape_cast %213 : vector<1x8x1xf32> to vector<8x1xf32>
    %215 = vector.shape_cast %188 : vector<8x1xf32> to vector<1x8x1xf32>
    tpu.vector_store %arg18[%c3_158, %c0_159, %c0_160], %215 {strides = array<i32>} : memref<4x8x1xf32, #tpu.memory_space<vmem>>, vector<1x8x1xf32>,
    %c1_i32 = arith.constant 1 : i32
    %216 = arith.cmpi eq, %arg1, %c1_i32 : i32
    %217 = arith.extui %216 : i1 to i32
    %c0_i32_161 = arith.constant 0 : i32
    %218 = arith.cmpi ne, %217, %c0_i32_161 : i32
    scf.if %218 {
      %c0_162 = arith.constant 0 : index
      %c0_163 = arith.constant 0 : index
      %c0_164 = arith.constant 0 : index
      %219 = vector.load %arg20[%c0_162, %c0_163, %c0_164] : memref<4x8x8xf32, #tpu.memory_space<vmem>>, vector<1x8x8xf32>
      %220 = vector.shape_cast %219 : vector<1x8x8xf32> to vector<8x8xf32>
      %c0_165 = arith.constant 0 : index
      %c0_166 = arith.constant 0 : index
      %c0_167 = arith.constant 0 : index
      %221 = vector.load %arg19[%c0_165, %c0_166, %c0_167] : memref<4x8x1xf32, #tpu.memory_space<vmem>>, vector<1x8x1xf32>
      %222 = vector.shape_cast %221 : vector<1x8x1xf32> to vector<8x1xf32>
      %223 = tpu.reciprocal %222 {approx = true} : vector<8x1xf32> -> vector<8x1xf32>
      %224 = vector.broadcast %223 : vector<8x1xf32> to vector<8x8xf32>
      %225 = arith.mulf %220, %224 : vector<8x8xf32>
      %226 = arith.truncf %225 : vector<8x8xf32> to vector<8x8xbf16>
      %c0_168 = arith.constant 0 : index
      %c0_169 = arith.constant 0 : index
      %c0_170 = arith.constant 0 : index
      %227 = vector.load %arg9[%c0_168, %c0_169, %c0_170] : memref<4x8x32xbf16, #tpu.memory_space<vmem>>, vector<1x8x32xbf16>
      %228 = vector.shape_cast %227 : vector<1x8x32xbf16> to vector<8x32xbf16>
      %cst_171 = arith.constant dense<0.000000e+00> : vector<8x32xf32>
      %229 = tpu.matmul %226, %228, %cst_171 {dimension_numbers = #tpu.dot_dimension_numbers<[1], [0], [0], [1], [0, 0, 1, 1], [], []>} : vector<8x8xbf16>, vector<8x32xbf16>, vector<8x32xf32> -> vector<8x32xf32>
      %c1_172 = arith.constant 1 : index
      %c0_173 = arith.constant 0 : index
      %c0_174 = arith.constant 0 : index
      %230 = vector.load %arg20[%c1_172, %c0_173, %c0_174] : memref<4x8x8xf32, #tpu.memory_space<vmem>>, vector<1x8x8xf32>
      %231 = vector.shape_cast %230 : vector<1x8x8xf32> to vector<8x8xf32>
      %c1_175 = arith.constant 1 : index
      %c0_176 = arith.constant 0 : index
      %c0_177 = arith.constant 0 : index
      %232 = vector.load %arg19[%c1_175, %c0_176, %c0_177] : memref<4x8x1xf32, #tpu.memory_space<vmem>>, vector<1x8x1xf32>
      %233 = vector.shape_cast %232 : vector<1x8x1xf32> to vector<8x1xf32>
      %234 = tpu.reciprocal %233 {approx = true} : vector<8x1xf32> -> vector<8x1xf32>
      %235 = vector.broadcast %234 : vector<8x1xf32> to vector<8x8xf32>
      %236 = arith.mulf %231, %235 : vector<8x8xf32>
      %237 = arith.truncf %236 : vector<8x8xf32> to vector<8x8xbf16>
      %c1_178 = arith.constant 1 : index
      %c0_179 = arith.constant 0 : index
      %c0_180 = arith.constant 0 : index
      %238 = vector.load %arg9[%c1_178, %c0_179, %c0_180] : memref<4x8x32xbf16, #tpu.memory_space<vmem>>, vector<1x8x32xbf16>
      %239 = vector.shape_cast %238 : vector<1x8x32xbf16> to vector<8x32xbf16>
      %cst_181 = arith.constant dense<0.000000e+00> : vector<8x32xf32>
      %240 = tpu.matmul %237, %239, %cst_181 {dimension_numbers = #tpu.dot_dimension_numbers<[1], [0], [0], [1], [0, 0, 1, 1], [], []>} : vector<8x8xbf16>, vector<8x32xbf16>, vector<8x32xf32> -> vector<8x32xf32>
      %241 = arith.addf %229, %240 : vector<8x32xf32>
      %c2_182 = arith.constant 2 : index
      %c0_183 = arith.constant 0 : index
      %c0_184 = arith.constant 0 : index
      %242 = vector.load %arg20[%c2_182, %c0_183, %c0_184] : memref<4x8x8xf32, #tpu.memory_space<vmem>>, vector<1x8x8xf32>
      %243 = vector.shape_cast %242 : vector<1x8x8xf32> to vector<8x8xf32>
      %c2_185 = arith.constant 2 : index
      %c0_186 = arith.constant 0 : index
      %c0_187 = arith.constant 0 : index
      %244 = vector.load %arg19[%c2_185, %c0_186, %c0_187] : memref<4x8x1xf32, #tpu.memory_space<vmem>>, vector<1x8x1xf32>
      %245 = vector.shape_cast %244 : vector<1x8x1xf32> to vector<8x1xf32>
      %246 = tpu.reciprocal %245 {approx = true} : vector<8x1xf32> -> vector<8x1xf32>
      %247 = vector.broadcast %246 : vector<8x1xf32> to vector<8x8xf32>
      %248 = arith.mulf %243, %247 : vector<8x8xf32>
      %249 = arith.truncf %248 : vector<8x8xf32> to vector<8x8xbf16>
      %c2_188 = arith.constant 2 : index
      %c0_189 = arith.constant 0 : index
      %c0_190 = arith.constant 0 : index
      %250 = vector.load %arg9[%c2_188, %c0_189, %c0_190] : memref<4x8x32xbf16, #tpu.memory_space<vmem>>, vector<1x8x32xbf16>
      %251 = vector.shape_cast %250 : vector<1x8x32xbf16> to vector<8x32xbf16>
      %cst_191 = arith.constant dense<0.000000e+00> : vector<8x32xf32>
      %252 = tpu.matmul %249, %251, %cst_191 {dimension_numbers = #tpu.dot_dimension_numbers<[1], [0], [0], [1], [0, 0, 1, 1], [], []>} : vector<8x8xbf16>, vector<8x32xbf16>, vector<8x32xf32> -> vector<8x32xf32>
      %253 = arith.addf %241, %252 : vector<8x32xf32>
      %c3_192 = arith.constant 3 : index
      %c0_193 = arith.constant 0 : index
      %c0_194 = arith.constant 0 : index
      %254 = vector.load %arg20[%c3_192, %c0_193, %c0_194] : memref<4x8x8xf32, #tpu.memory_space<vmem>>, vector<1x8x8xf32>
      %255 = vector.shape_cast %254 : vector<1x8x8xf32> to vector<8x8xf32>
      %c3_195 = arith.constant 3 : index
      %c0_196 = arith.constant 0 : index
      %c0_197 = arith.constant 0 : index
      %256 = vector.load %arg19[%c3_195, %c0_196, %c0_197] : memref<4x8x1xf32, #tpu.memory_space<vmem>>, vector<1x8x1xf32>
      %257 = vector.shape_cast %256 : vector<1x8x1xf32> to vector<8x1xf32>
      %258 = tpu.reciprocal %257 {approx = true} : vector<8x1xf32> -> vector<8x1xf32>
      %259 = vector.broadcast %258 : vector<8x1xf32> to vector<8x8xf32>
      %260 = arith.mulf %255, %259 : vector<8x8xf32>
      %261 = arith.truncf %260 : vector<8x8xf32> to vector<8x8xbf16>
      %c3_198 = arith.constant 3 : index
      %c0_199 = arith.constant 0 : index
      %c0_200 = arith.constant 0 : index
      %262 = vector.load %arg9[%c3_198, %c0_199, %c0_200] : memref<4x8x32xbf16, #tpu.memory_space<vmem>>, vector<1x8x32xbf16>
      %263 = vector.shape_cast %262 : vector<1x8x32xbf16> to vector<8x32xbf16>
      %cst_201 = arith.constant dense<0.000000e+00> : vector<8x32xf32>
      %264 = tpu.matmul %261, %263, %cst_201 {dimension_numbers = #tpu.dot_dimension_numbers<[1], [0], [0], [1], [0, 0, 1, 1], [], []>} : vector<8x8xbf16>, vector<8x32xbf16>, vector<8x32xf32> -> vector<8x32xf32>
      %265 = arith.addf %253, %264 : vector<8x32xf32>
      %c0_202 = arith.constant 0 : index
      %c0_203 = arith.constant 0 : index
      %c0_204 = arith.constant 0 : index
      %266 = vector.load %arg2[%c0_202, %c0_203, %c0_204] : memref<1x8x32xf32, #tpu.memory_space<vmem>>, vector<1x8x32xf32>
      %267 = vector.shape_cast %266 : vector<1x8x32xf32> to vector<8x32xf32>
      %268 = arith.addf %267, %265 : vector<8x32xf32>
      %c0_205 = arith.constant 0 : index
      %c0_206 = arith.constant 0 : index
      %269 = vector.load %arg13[%c0_205, %c0_206] : memref<1x32xf32, #tpu.memory_space<vmem>>, vector<1x32xf32>
      %270 = vector.broadcast %269 : vector<1x32xf32> to vector<8x32xf32>
      %271 = arith.addf %268, %270 : vector<8x32xf32>
      %cst_207 = arith.constant dense<0.000000e+00> : vector<8xf32>
      %272 = vector.multi_reduction <add>, %271, %cst_207 [1] : vector<8x32xf32> to vector<8xf32>
      %273 = vector.shape_cast %272 : vector<8xf32> to vector<8x1xf32>
      %cst_208 = arith.constant 3.200000e+01 : f32
      %274 = vector.broadcast %cst_208 : f32 to vector<8x1xf32>
      %275 = arith.divf %273, %274 : vector<8x1xf32>
      %276 = vector.broadcast %275 : vector<8x1xf32> to vector<8x32xf32>
      %277 = arith.subf %271, %276 : vector<8x32xf32>
      %278 = arith.mulf %277, %277 : vector<8x32xf32>
      %cst_209 = arith.constant dense<0.000000e+00> : vector<8xf32>
      %279 = vector.multi_reduction <add>, %278, %cst_209 [1] : vector<8x32xf32> to vector<8xf32>
      %280 = vector.shape_cast %279 : vector<8xf32> to vector<8x1xf32>
      %cst_210 = arith.constant 3.200000e+01 : f32
      %281 = vector.broadcast %cst_210 : f32 to vector<8x1xf32>
      %282 = arith.divf %280, %281 : vector<8x1xf32>
      %cst_211 = arith.constant 9.99999974E-6 : f32
      %283 = vector.broadcast %cst_211 : f32 to vector<8x1xf32>
      %284 = arith.addf %282, %283 : vector<8x1xf32>
      %285 = math.rsqrt %284 : vector<8x1xf32>
      %286 = vector.broadcast %285 : vector<8x1xf32> to vector<8x32xf32>
      %287 = arith.mulf %277, %286 : vector<8x32xf32>
      %c0_212 = arith.constant 0 : index
      %c0_213 = arith.constant 0 : index
      %288 = vector.load %arg14[%c0_212, %c0_213] : memref<1x32xf32, #tpu.memory_space<vmem>>, vector<1x32xf32>
      %289 = vector.broadcast %288 : vector<1x32xf32> to vector<8x32xf32>
      %290 = arith.mulf %287, %289 : vector<8x32xf32>
      %c0_214 = arith.constant 0 : index
      %c0_215 = arith.constant 0 : index
      %291 = vector.load %arg15[%c0_214, %c0_215] : memref<1x32xf32, #tpu.memory_space<vmem>>, vector<1x32xf32>
      %292 = vector.broadcast %291 : vector<1x32xf32> to vector<8x32xf32>
      %293 = arith.addf %290, %292 : vector<8x32xf32>
      %c0_216 = arith.constant 0 : index
      %c0_217 = arith.constant 0 : index
      %c0_218 = arith.constant 0 : index
      %294 = vector.load %arg16[%c0_216, %c0_217, %c0_218] : memref<1x8x32xf32, #tpu.memory_space<vmem>>, vector<1x8x32xf32>
      %295 = vector.shape_cast %294 : vector<1x8x32xf32> to vector<8x32xf32>
      %296 = vector.shape_cast %293 : vector<8x32xf32> to vector<1x8x32xf32>
      tpu.vector_store %arg16[%c0_216, %c0_217, %c0_218], %296 {strides = array<i32>} : memref<1x8x32xf32, #tpu.memory_space<vmem>>, vector<1x8x32xf32>,
    } else {
    }
    return
  }
  func.func @transform_0(%arg0: i32, %arg1: i32) -> (i32, i32, i32) {
    %c0_i32 = arith.constant 0 : i32
    %c0_i32_0 = arith.constant 0 : i32
    %c0_i32_1 = arith.constant 0 : i32
    return %arg0, %c0_i32, %c0_i32_0 : i32, i32, i32
  }
  func.func @transform_1(%arg0: i32, %arg1: i32) -> (i32, i32, i32) {
    %c0_i32 = arith.constant 0 : i32
    %c0_i32_0 = arith.constant 0 : i32
    %c0_i32_1 = arith.constant 0 : i32
    return %arg0, %c0_i32, %c0_i32_0 : i32, i32, i32
  }
  func.func @transform_2(%arg0: i32, %arg1: i32) -> (i32, i32, i32) {
    %c0_i32 = arith.constant 0 : i32
    %c0_i32_0 = arith.constant 0 : i32
    return %arg0, %arg1, %c0_i32 : i32, i32, i32
  }
  func.func @transform_3(%arg0: i32, %arg1: i32) -> (i32, i32, i32) {
    %c0_i32 = arith.constant 0 : i32
    %c0_i32_0 = arith.constant 0 : i32
    return %arg0, %arg1, %c0_i32 : i32, i32, i32
  }
  func.func @transform_4(%arg0: i32, %arg1: i32) -> (i32, i32, i32) {
    %c0_i32 = arith.constant 0 : i32
    %c0_i32_0 = arith.constant 0 : i32
    %c0_i32_1 = arith.constant 0 : i32
    %c0_i32_2 = arith.constant 0 : i32
    return %c0_i32, %c0_i32_0, %c0_i32_1 : i32, i32, i32
  }
  func.func @transform_5(%arg0: i32, %arg1: i32) -> (i32, i32, i32) {
    %c0_i32 = arith.constant 0 : i32
    %c0_i32_0 = arith.constant 0 : i32
    %c0_i32_1 = arith.constant 0 : i32
    %c0_i32_2 = arith.constant 0 : i32
    return %c0_i32, %c0_i32_0, %c0_i32_1 : i32, i32, i32
  }
  func.func @transform_6(%arg0: i32, %arg1: i32) -> (i32, i32, i32) {
    %c0_i32 = arith.constant 0 : i32
    %c0_i32_0 = arith.constant 0 : i32
    %c0_i32_1 = arith.constant 0 : i32
    %c0_i32_2 = arith.constant 0 : i32
    return %c0_i32, %c0_i32_0, %c0_i32_1 : i32, i32, i32
  }
  func.func @transform_7(%arg0: i32, %arg1: i32) -> (i32, i32, i32) {
    %c0_i32 = arith.constant 0 : i32
    %c0_i32_0 = arith.constant 0 : i32
    %c0_i32_1 = arith.constant 0 : i32
    %c0_i32_2 = arith.constant 0 : i32
    return %c0_i32, %c0_i32_0, %c0_i32_1 : i32, i32, i32
  }
  func.func @transform_8(%arg0: i32, %arg1: i32) -> (i32, i32, i32) {
    %c0_i32 = arith.constant 0 : i32
    %c0_i32_0 = arith.constant 0 : i32
    %c0_i32_1 = arith.constant 0 : i32
    %c0_i32_2 = arith.constant 0 : i32
    return %c0_i32, %c0_i32_0, %c0_i32_1 : i32, i32, i32
  }
  func.func @transform_9(%arg0: i32, %arg1: i32) -> (i32, i32, i32) {
    %c0_i32 = arith.constant 0 : i32
    %c0_i32_0 = arith.constant 0 : i32
    %c0_i32_1 = arith.constant 0 : i32
    %c0_i32_2 = arith.constant 0 : i32
    return %c0_i32, %c0_i32_0, %c0_i32_1 : i32, i32, i32
  }
  func.func @transform_10(%arg0: i32, %arg1: i32) -> (i32, i32, i32) {
    %c0_i32 = arith.constant 0 : i32
    %c0_i32_0 = arith.constant 0 : i32
    %c0_i32_1 = arith.constant 0 : i32
    %c0_i32_2 = arith.constant 0 : i32
    return %c0_i32, %c0_i32_0, %c0_i32_1 : i32, i32, i32
  }
  func.func @transform_11(%arg0: i32, %arg1: i32) -> (i32, i32) {
    %c0_i32 = arith.constant 0 : i32
    %c0_i32_0 = arith.constant 0 : i32
    %c0_i32_1 = arith.constant 0 : i32
    return %c0_i32, %c0_i32_0 : i32, i32
  }
  func.func @transform_12(%arg0: i32, %arg1: i32) -> (i32, i32) {
    %c0_i32 = arith.constant 0 : i32
    %c0_i32_0 = arith.constant 0 : i32
    %c0_i32_1 = arith.constant 0 : i32
    return %c0_i32, %c0_i32_0 : i32, i32
  }
  func.func @transform_13(%arg0: i32, %arg1: i32) -> (i32, i32) {
    %c0_i32 = arith.constant 0 : i32
    %c0_i32_0 = arith.constant 0 : i32
    %c0_i32_1 = arith.constant 0 : i32
    return %c0_i32, %c0_i32_0 : i32, i32
  }
  func.func @transform_14(%arg0: i32, %arg1: i32) -> (i32, i32, i32) {
    %c0_i32 = arith.constant 0 : i32
    %c0_i32_0 = arith.constant 0 : i32
    %c0_i32_1 = arith.constant 0 : i32
    return %arg0, %c0_i32, %c0_i32_0 : i32, i32, i32
  }
}

</mosaic_0001>

<bundles_post_ra>
// kernel: tpu_custom_call.1
= control target key start
LH: loop header
LB: loop body
LE: loop exit
PB: predicated region body
PF: predicated region fallthrough
CT: control target
= control target key end

     0   :  { %s3486_s0 = inlined_call_operand.vmem [shape: f32[2,8,32], index: 0, kind: input, shape index: {}]   ;;  %s3487_s1 = inlined_call_operand.vmem [shape: f32[2,8,32], index: 1, kind: input, shape index: {}]   ;;  %s3488_s2 = inlined_call_operand.vmem [shape: f32[2,16,32], index: 2, kind: input, shape index: {}]   ;;  %s3489_s3 = inlined_call_operand.vmem [shape: f32[2,16,32], index: 3, kind: input, shape index: {}]   ;;  %s3490_s4 = inlined_call_operand.vmem [shape: bf16[4,32,8], index: 4, kind: input, shape index: {}]   ;;  %s3491_s5 = inlined_call_operand.vmem [shape: bf16[4,32,8], index: 5, kind: input, shape index: {}]   ;;  %s3492_s6 = inlined_call_operand.vmem [shape: bf16[4,32,8], index: 6, kind: input, shape index: {}]   ;;  %s3493_s7 = inlined_call_operand.vmem [shape: bf16[4,8,32], index: 7, kind: input, shape index: {}]   ;;  %s3494_s8 = inlined_call_operand.vmem [shape: f32[4,1,8], index: 8, kind: input, shape index: {}]   ;;  %s3495_s9 = inlined_call_operand.vmem [shape: f32[4,1,8], index: 9, kind: input, shape index: {}]   ;;  %s3496_s10 = inlined_call_operand.vmem [shape: f32[4,1,8], index: 10, kind: input, shape index: {}]   ;;  %s3497_s11 = inlined_call_operand.vmem [shape: f32[1,32], index: 11, kind: input, shape index: {}]   ;;  %s3498_s12 = inlined_call_operand.vmem [shape: f32[1,32], index: 12, kind: input, shape index: {}]   ;;  %s3499_s13 = inlined_call_operand.vmem [shape: f32[1,32], index: 13, kind: input, shape index: {}]   ;;  %s3500_s14 = inlined_call_operand.hbm [shape: f32[2,8,32], index: 14, kind: output, shape index: {}]  }
   0x1   :  { %3515 = sst [smem:[#allocation21_spill]] %s3498_s12 }
   0x2   :  { %3516 = sst [smem:[#allocation22_spill]] %s3499_s13 }
   0x3   :  { %3517 = sst [smem:[#allocation23_spill]] %s3500_s14 }
   0x4   :  { %19 = vsyncpa [#allocation7], 0 }
   0x5   :  { %21 = vsyncpa [#allocation7 + $0x1], 0  ;;  %s2996_s29 = smov 0   ;;  %s2998_s30 = smov 0  }
   0x6   :  { %s3000_s15 = smov 0   ;;  %s3002_s16 = smov 0  }
   0x7   :  { %s3004_s17 = smov 0   ;;  %s3006_s18 = smov 0  }
   0x8   :  { %s3008_s19 = smov 0   ;;  %s3010_s20 = smov 0  }
   0x9 LB: > { %3518 = sst [smem:[#allocation9_spill]] %s2881_s29  ;;  %s2324_s21 = sadd.s32 4294967295, %s2909_s20   ;;  %s2909_s20 = sphi %s3010_s20, %s27_s20   ;;  %s2905_s19 = sphi %s3008_s19, %s3549_s19   ;;  %s2901_s18 = sphi %s3006_s18, %s3548_s18   ;;  %s2897_s17 = sphi %s3004_s17, %s3547_s17   ;;  %s2893_s16 = sphi %s3002_s16, %s3546_s16   ;;  %s2889_s15 = sphi %s3000_s15, %s3545_s15   ;;  %s2885_s30 = sphi %s2998_s30, %s3544_s30   ;;  %s2881_s29 = sphi %s2996_s29, %s3543_s29  }
   0xa   : > { %3519 = sst [smem:[#allocation10_spill]] %s2885_s30  ;;  %s2325_s22 = sadd.s32 4294967294, %s2909_s20  }
   0xb   : > { %3520 = sst [smem:[#allocation11_spill]] %s2889_s15  ;;  %s36_s23 = sadd.s32 1, %s2901_s18 }
   0xc   : > { %3521 = sst [smem:[#allocation12_spill]] %s2897_s17  ;;  %p37_p0 = scmp.ge.s32.totalorder %s36_s23, 2 }
   0xd   : > { %3522 = sst [smem:[#allocation13_spill]] %s2901_s18  ;;  %s39_s24 = sadd.s32 1, %s2905_s19 }
   0xe   : > { %3523 = sst [smem:[#allocation14_spill]] %s2905_s19  ;;  %p374_p1 = scmp.ne.s32.totalorder %s2889_s15, %s2885_s30 }
   0xf   : > { %3524 = sst [smem:[#allocation15_spill]] %s2909_s20  ;;  %p375_p2 = scmp.eq.s32.totalorder %s2324_s21, 3 }
  0x10   : > { %s3551_s23 = smov (%p37_p0, %s36_s23), 0  ;;  %s3553_s24 = smov (!%p37_p0, %s39_s24), %s2905_s19 }
  0x11   : > { %3525 = sst [smem:[#allocation16_spill]] %s3551_s23  ;;  %p3045_p3 = por %p375_p2, %p374_p1 }
  0x12   : > { %p380_p4 = scmp.ne.s32.totalorder %s2885_s30, %s2881_s29  ;;  %p41_p5 = scmp.ge.s32.totalorder %s3553_s24, 2 }
  0x13   : > { %s3526_s25 = scalar_select %p3045_p3, 1, 0 }
  0x14   : > { %p381_p6 = scmp.eq.s32.totalorder %s2325_s22, 3  ;;  %p2328_p7 = scmp.ge.s32.totalorder %s2909_s20, 1 }
  0x15   : > { %3527 = sst [smem:[#allocation17_spill]] %s3526_s25  ;;  %p465_p8 = scmp.lt.s32.totalorder %s2909_s20, 5 }
  0x16   : > { %s3555_s24 = smov (%p41_p5, %s3553_s24), 0  ;;  %p3055_p9 = por %p381_p6, %p380_p4 }
  0x17   : > { %3528 = sst [smem:[#allocation18_spill]] %s3555_s24  ;;  %p466_p10 = pnand %p2328_p7, %p465_p8 }
  0x18   : > { %s3529_s26 = scalar_select %p3055_p9, 1, 0 }
  0x19   : > { %s361_s27 = ssub.s32 %s2905_s19, %s3555_s24  ;;  %s364_s28 = sadd.s32 1, %s2889_s15 }
  0x1a   : > { %3530 = sst [smem:[#allocation19_spill]] %s3529_s26  ;;  %p362_p11 = scmp.eq.s32.totalorder %s361_s27, 0 }
  0x1b   : > { %469 = sbr.rel (%p466_p10) target bundleno = 2556 (0x9fc), region = 76  ;;  %s3512_s22 = sand.u32 (!%p466_p10), 1, %s2885_s30  }
  0x1c   : > { %s3063_s21 = scalar_select %p362_p11, %s2889_s15, %s364_s28  }
  0x1d   : > { %p530_p12 = scmp.lt.s32.totalorder (!%p466_p10), %s2897_s17, 1  ;;  %s3069_s23 = sshll.u32 (!%p466_p10), %s3512_s22, 3 }
  0x1e   : > { %3531 = sst [smem:[#allocation20_spill]] %s3063_s21  ;;  %p540_p13 = scmp.lt.s32.totalorder (!%p466_p10), %s2893_s16, 1 }
  0x1f   : > { %s529_s21 = scalar_lea.vmem (!%p466_p10), [#allocation6], %s3069_s23  ;;  %p2336_p0 = scmp.ne.s32.totalorder (!%p466_p10), %s2893_s16, 0 }
  0x22   : > { %s531_s18 = scalar_select %p530_p12, %s2897_s17, 1 }
  0x23   : > { %s541_s24 = scalar_select %p540_p13, %s2893_s16, 1 }
  0x24   : > { %s2330_s19 = sshll.u32 %s531_s18, 3  ;;  %s2332_s27 = sshll.u32 %s531_s18, 1  ;;  %vm841_vm0 = vcmask (!%p2336_p0), 7168   ;;  %vm850_vm1 = vcmask (!%p2336_p0), 64512   ;;  %v2911_v0 = vmov (!%p2336_p0), 0.0   ;;  %v2912_v1 = vmov (!%p2336_p0), -inf  }
  0x25   : > { %s3077_s15 = scalar_lea.vmem %s3486_s0, %s2330_s19  ;;  %s3082_s20 = scalar_lea.vmem %s3487_s1, %s2330_s19  ;;  %2513 = vmatprep.subr.bf16.mxu0 (!%p2336_p0), %v2911_v0  ;;  %842 = vst.msk [vmem:[#allocation3] sm:$0xff] (!%p2336_p0), %vm841_vm0, %v2912_v1  ;;  %843 = vst.msk [vmem:[#allocation3 + $0x8] sm:$0xff] (!%p2336_p0), %vm841_vm0, %v2912_v1  ;;  %2521 = vmatprep.subr.bf16.mxu1 (!%p2336_p0), %v2911_v0  ;;  %v2761_v2 = vld [vmem:[%s3490_s4] sm:$0xff] (!%p2336_p0)   ;;  %v2762_v3 = vld [vmem:[%s3490_s4 + $0x10] sm:$0xff] (!%p2336_p0)   ;;  %vm2913_vm2 = vmmov (!%p2336_p0), 0   ;;  %vm586_vm3 = vcmask (!%p2336_p0), 261120  }
  0x26   : > { %s543_s14 = sadd.s32 %s2332_s27, %s541_s24  ;;  %558 = sbr.rel (%p2336_p0) target bundleno = 273 (0x111), region = 80  ;;  %844 = vst.msk [vmem:[#allocation3 + $0x10] sm:$0xff] (!%p2336_p0), %vm841_vm0, %v2912_v1  ;;  %845 = vst.msk [vmem:[#allocation3 + $0x18] sm:$0xff] (!%p2336_p0), %vm841_vm0, %v2912_v1  ;;  %2517 = vmatprep.mubr.msk.bf16.mxu0 (!%p2336_p0), %vm2913_vm2, %v2911_v0  ;;  %2525 = vmatprep.mubr.msk.bf16.mxu1 (!%p2336_p0), %vm2913_vm2, %v2911_v0  ;;  %v2763_v4 = vld [vmem:[%s3490_s4 + $0x8] sm:$0xff] (!%p2336_p0)   ;;  %v2764_v5 = vld [vmem:[%s3490_s4 + $0x18] sm:$0xff] (!%p2336_p0)   ;;  %vm632_vm4 = vcmask (!%p2336_p0), 60416  }
  0x27   : > { %s2333_s25 = sshll.u32 %s543_s14, 3  ;;  %846 = vst.msk [vmem:[#allocation4] sm:$0xff] (!%p2336_p0), %vm841_vm0, %v2911_v0  ;;  %847 = vst.msk [vmem:[#allocation4 + $0x8] sm:$0xff] (!%p2336_p0), %vm841_vm0, %v2911_v0  ;;  %2514 = vmatpush3.bf16.msra.mxu0 (!%p2336_p0), %v2761_v2  ;;  %2522 = vmatpush3.bf16.msra.mxu1 (!%p2336_p0), %v2762_v3  ;;  %v559_v6 = vld [vmem:[%s3077_s15] sm:$0xff] (!%p2336_p0)  ;;  %v2766_v11 = vld [vmem:[%s3490_s4 + $0x30] sm:$0xff] (!%p2336_p0)  }
  0x28   : > { %s3087_s13 = scalar_lea.vmem %s3488_s2, %s2333_s25  ;;  %s3092_s18 = scalar_lea.vmem %s3489_s3, %s2333_s25  ;;  %848 = vst.msk [vmem:[#allocation4 + $0x10] sm:$0xff] (!%p2336_p0), %vm841_vm0, %v2911_v0  ;;  %849 = vst.msk [vmem:[#allocation4 + $0x18] sm:$0xff] (!%p2336_p0), %vm841_vm0, %v2911_v0  ;;  %2515 = vmatprep.subr.bf16.mxu0 (!%p2336_p0), %v2911_v0  ;;  %2523 = vmatprep.subr.bf16.mxu1 (!%p2336_p0), %v2911_v0  ;;  %v560_v7 = vld [vmem:[%s3082_s20] sm:$0xff] (!%p2336_p0)  ;;  %v2767_v12 = vld [vmem:[%s3490_s4 + $0x28] sm:$0xff] (!%p2336_p0)  }
  0x29   : > { %851 = vst.msk [vmem:[#allocation5] sm:$0xff] (!%p2336_p0), %vm850_vm1, %v2911_v0  ;;  %852 = vst.msk [vmem:[#allocation5 + $0x8] sm:$0xff] (!%p2336_p0), %vm850_vm1, %v2911_v0  ;;  %v561_v8 = vadd.f32 (!%p2336_p0), %v560_v7, %v559_v6  ;;  %v2765_v9 = vld [vmem:[%s3490_s4 + $0x20] sm:$0xff] (!%p2336_p0)   ;;  %v2768_v13 = vld [vmem:[%s3490_s4 + $0x38] sm:$0xff] (!%p2336_p0)  }
  0x2a   : > { %853 = vst.msk [vmem:[#allocation5 + $0x10] sm:$0xff] (!%p2336_p0), %vm850_vm1, %v2911_v0  ;;  %854 = vst.msk [vmem:[#allocation5 + $0x18] sm:$0xff] (!%p2336_p0), %vm850_vm1, %v2911_v0  ;;  %v2337_v14 = vld [vmem:[%s3494_s8] ss:$0 sm:$0xff] (!%p2336_p0)  ;;  %v2346_v15 = vld [vmem:[%s3494_s8 + $0x1] ss:$0 sm:$0xff] (!%p2336_p0) }
  0x2b   : > { %2516 = vmatpush3.bf16.msra.mxu0 (!%p2336_p0), %v2763_v4  ;;  %2524 = vmatpush3.bf16.msra.mxu1 (!%p2336_p0), %v2764_v5  ;;  %v562_v10 = vpack.c.bf16 (!%p2336_p0), %v561_v8, %v561_v8  ;;  %v2355_v30 = vld [vmem:[%s3494_s8 + $0x2] ss:$0 sm:$0xff] (!%p2336_p0)  ;;  %v2364_v31 = vld [vmem:[%s3494_s8 + $0x3] ss:$0 sm:$0xff] (!%p2336_p0) }
  0x2c   : > { %2529 = vmatprep.subr.bf16.mxu0 (!%p2336_p0), %v2911_v0  ;;  %2537 = vmatprep.subr.bf16.mxu1 (!%p2336_p0), %v2911_v0 }
  0x2e   : > { %2518 = vmatmul.mubr.msk.bf16.vlgmr.msra.gmra.mrb[0].mxu0 %vm586_vm3, %v562_v10  ;;  %2526 = vmatmul.mubr.msk.bf16.vlgmr.msra.gmra.mrb[0].mxu1 %vm586_vm3, %v562_v10 }
  0x2f   : > { %2530 = vmatpush3.bf16.msra.mxu0 %v2765_v9  ;;  %2538 = vmatpush3.bf16.msra.mxu1 %v2766_v11 }
  0x30   : > { %2531 = vmatprep.subr.bf16.mxu0 %v2911_v0  ;;  %2539 = vmatprep.subr.bf16.mxu1 %v2911_v0 }
  0x31   : > { %2533 = vmatprep.mubr.msk.bf16.mxu0 %vm2913_vm2, %v2911_v0  ;;  %2541 = vmatprep.mubr.msk.bf16.mxu1 %vm2913_vm2, %v2911_v0 }
  0x33   : > { %2532 = vmatpush3.bf16.msra.mxu0 %v2767_v12  ;;  %2540 = vmatpush3.bf16.msra.mxu1 %v2768_v13 }
  0x36   : > { %2534 = vmatmul.mubr.msk.bf16.vlgmr.msra.gmra.mrb[4].mxu0 %vm586_vm3, %v562_v10  ;;  %2542 = vmatmul.mubr.msk.bf16.vlgmr.msra.gmra.mrb[4].mxu1 %vm586_vm3, %v562_v10 }
 0x101   : > { %v624_v16 = vpop.f32.mrb[0].mxu0  ;;  %v693_v18 = vpop.f32.mrb[0].mxu1 }
 0x102   : > { %v625_v17 = vadd.f32 %v2337_v14, %v624_v16  ;;  %v2519_v19 = vpop.f32.mrb[1].mxu0  ;;  %v694_v20 = vadd.f32 %v2346_v15, %v693_v18  ;;  %v2527_v21 = vpop.f32.mrb[1].mxu1 }
 0x103   : > { %v627_v22 = vpop.f32.mrb[2].mxu0  ;;  %v696_v24 = vpop.f32.mrb[2].mxu1 }
 0x104   : > { %v630_v23 = vmul.f32 0.35355338, %v625_v17  ;;  %v2520_v25 = vpop.f32.mrb[3].mxu0  ;;  %v699_v26 = vmul.f32 0.35355338, %v694_v20  ;;  %v2528_v27 = vpop.f32.mrb[3].mxu1 }
 0x106   : > { %v631_v28 = vpack.c.bf16 %v630_v23, %v630_v23  ;;  %v700_v29 = vpack.c.bf16 %v699_v26, %v699_v26 }
 0x108   : > { %633 = vst.msk [vmem:[#allocation2] sm:$0xf] %vm632_vm4, %v631_v28  ;;  %702 = vst.msk [vmem:[#allocation2 + $0x4] sm:$0xf] %vm632_vm4, %v700_v29 }
 0x109   : > { %v762_v32 = vpop.f32.mrb[4].mxu0  ;;  %v831_v34 = vpop.f32.mrb[4].mxu1 }
 0x10a   : > { %v763_v33 = vadd.f32 %v2355_v30, %v762_v32  ;;  %v2535_v35 = vpop.f32.mrb[5].mxu0  ;;  %v832_v36 = vadd.f32 %v2364_v31, %v831_v34  ;;  %v2543_v37 = vpop.f32.mrb[5].mxu1 }
 0x10b   : > { %v765_v38 = vpop.f32.mrb[6].mxu0  ;;  %v834_v40 = vpop.f32.mrb[6].mxu1 }
 0x10c   : > { %v768_v39 = vmul.f32 0.35355338, %v763_v33  ;;  %v2536_v41 = vpop.f32.mrb[7].mxu0  ;;  %v837_v42 = vmul.f32 0.35355338, %v832_v36  ;;  %v2544_v43 = vpop.f32.mrb[7].mxu1 }
 0x10e   : > { %v769_v44 = vpack.c.bf16 %v768_v39, %v768_v39  ;;  %v838_v45 = vpack.c.bf16 %v837_v42, %v837_v42 }
 0x110   : > { %771 = vst.msk [vmem:[#allocation2 + $0x8] sm:$0xf] %vm632_vm4, %v769_v44  ;;  %840 = vst.msk [vmem:[#allocation2 + $0xc] sm:$0xf] %vm632_vm4, %v838_v45 }
 0x111 PF: > { %v2771_v46 = vld [vmem:[%s3491_s5] sm:$0xff]   ;;  %v2914_v47 = vmov 0.0   ;;  %v2772_v48 = vld [vmem:[%s3491_s5 + $0x8] sm:$0xff]   ;;  %vm2915_vm5 = vmmov 0   ;;  %vm883_vm6 = vcmask 261120   ;;  %vm996_vm7 = vcmask 64512  }
 0x112   : > { %2545 = vmatprep.subr.bf16.mxu0 %v2914_v47  ;;  %2553 = vmatprep.subr.bf16.mxu1 %v2914_v47  ;;  %v855_v49 = vld [vmem:[%s3087_s13] sm:$0xff]  ;;  %v2773_v62 = vld [vmem:[%s3491_s5 + $0x10] sm:$0xff]   ;;  %v2774_v63 = vld [vmem:[%s3491_s5 + $0x18] sm:$0xff]   ;;  %v2916_v16 = vmov 0   ;;  %vm1065_vm8 = vcmask 7168   ;;  %vm1078_vm9 = vcmask 1043456  }
 0x113   : > { %2546 = vmatpush3.bf16.msra.mxu0 %v2771_v46  ;;  %2549 = vmatprep.mubr.msk.bf16.mxu0 %vm2915_vm5, %v2914_v47  ;;  %v856_v50 = vld [vmem:[%s3092_s18] sm:$0xff]  ;;  %v2778_v1 = vld [vmem:[%s3492_s6 + $0x8] sm:$0xff]   ;;  %v3195_v2 = vpack.c.bf16 %v855_v49, %v855_v49  ;;  %v3226_v20 = vld [vmem:[#allocation3] sm:$0xff]  ;;  %p2438_p1 = scmp.ne.s32.totalorder %s2893_s16, 1 }
 0x114   : > { %2547 = vmatprep.subr.bf16.mxu0 %v2914_v47  ;;  %v857_v51 = vadd.f32 %v856_v50, %v855_v49  ;;  %2557 = vmatprep.mubr.msk.bf16.mxu1 %vm2915_vm5, %v2914_v47  ;;  %v2368_v53 = vld [vmem:[%s3495_s9] ss:$0 sm:$0xff]  ;;  %v2383_v8 = vld [vmem:[%s3495_s9 + $0x1] ss:$0 sm:$0xff]  ;;  %v1258_v17 = vld [vmem:[#allocation2 + $0x4] sm:$0xf] }
 0x115   : > { %v995_v61 = vld [vmem:[#allocation2] sm:$0xf]  ;;  %2769 = vset.pattern.permute.xlu0 %v2916_v16  ;;  %2770 = vset.pattern.permute.xlu1 %v2916_v16  ;;  %v2776_v19 = vld [vmem:[%s3491_s5 + $0x28] sm:$0xff]   ;;  %v2779_v46 = vld [vmem:[%s3491_s5 + $0x30] sm:$0xff]   ;;  %vm2919_vm10 = vmmov (!%p2438_p1), 0   ;;  %s3532_s22 = sld [smem:[#allocation21_spill]] (!%p2438_p1) }
 0x116   : > { %v3161_v52 = vpack.c.bf16 %v857_v51, %v857_v51  ;;  %v2777_v0 = vld [vmem:[%s3492_s6] sm:$0xff]   ;;  %s3533_s20 = sld [smem:[#allocation22_spill]] (!%p2438_p1) }
 0x117   : > { %2548 = vmatpush3.bf16.msra.mxu0 %v2772_v48  ;;  %2554 = vmatpush3.bf16.msra.mxu1 %v2777_v0  ;;  %v2775_v18 = vld [vmem:[%s3491_s5 + $0x20] sm:$0xff]   ;;  %v1521_v45 = vld [vmem:[#allocation2 + $0x8] sm:$0xf]  ;;  %v2780_v48 = vld [vmem:[%s3491_s5 + $0x38] sm:$0xff]  }
 0x118   : > { %2561 = vmatprep.subr.bf16.mxu0 %v2914_v47  ;;  %2555 = vmatprep.subr.bf16.mxu1 %v2914_v47  ;;  %v2372_v24 = vld [vmem:[%s3496_s10] ss:$0 sm:$0xff]  ;;  %v2403_v37 = vld [vmem:[%s3495_s9 + $0x2] ss:$0 sm:$0xff] }
 0x11a   : > { %2550 = vmatmul.mubr.msk.bf16.vlgmr.msra.gmra.mrb[0].mxu0 %vm883_vm6, %v3161_v52 }
 0x11b   : > { %2563 = vmatprep.mubr.msk.bf16.mxu0 %vm2915_vm5, %v2914_v47  ;;  %2556 = vmatpush3.bf16.msra.mxu1 %v2778_v1  ;;  %v2423_v1 = vld [vmem:[%s3495_s9 + $0x3] ss:$0 sm:$0xff] }
 0x11c   : > { %2567 = vmatprep.subr.bf16.mxu1 %v2914_v47 }
 0x11e   : > { %2558 = vmatmul.mubr.msk.bf16.vlgmr.msra.gmra.mrb[0].mxu1 %vm883_vm6, %v3195_v2 }
 0x11f   : > { %2569 = vmatprep.mubr.msk.bf16.mxu1 %vm2915_vm5, %v2914_v47 }
 0x1ed   : > { %v921_v54 = vpop.f32.mrb[0].mxu0 }
 0x1ee   : > { %v922_v55 = vadd.f32 %v2368_v53, %v921_v54  ;;  %v2551_v56 = vpop.f32.mrb[1].mxu0  ;;  %v2781_v54 = vld [vmem:[%s3492_s6 + $0x10] sm:$0xff]  }
 0x1ef   : > { %v924_v57 = vpop.f32.mrb[2].mxu0  ;;  %v3285_v56 = vld [vmem:[#allocation3 + $0x8] sm:$0xff] }
 0x1f0   : > { %v927_v58 = vpack.c.bf16 %v922_v55, %v922_v55  ;;  %v2552_v59 = vpop.f32.mrb[3].mxu0 }
 0x1f1   : > { %v988_v25 = vpop.f32.mrb[0].mxu1 }
 0x1f2   : > { %v1001_v60 = vsel %vm996_vm7, %v927_v58, 0  ;;  %v989_v26 = vadd.f32 %v2372_v24, %v988_v25  ;;  %v2559_v27 = vpop.f32.mrb[1].mxu1 }
 0x1f3   : > { %2562 = vmatpush3.bf16.xpose.msra.mxu0 %v1001_v60  ;;  %v991_v28 = vpop.f32.mrb[2].mxu1 }
 0x1f4   : > { %2573 = vmatprep.subr.bf16.mxu0 %v2914_v47  ;;  %v994_v29 = vpack.c.bf16 %v989_v26, %v989_v26  ;;  %v2560_v30 = vpop.f32.mrb[3].mxu1 }
 0x1f5   : > { %v2783_v30 = vld [vmem:[%s3492_s6 + $0x20] sm:$0xff]  }
 0x1f6   : > { %v1080_v31 = vsel %vm1078_vm9, %v994_v29, 0 }
 0x1f7   : > { %2568 = vmatpush3.bf16.msra.mxu1 %v1080_v31 }
 0x1f8   : > { %2581 = vmatprep.subr.bf16.mxu1 %v2914_v47 }
 0x1fa   : > { %2564 = vmatmul.mubr.msk.bf16.vlgmr.msra.gmra.mrb[4].mxu0 %vm996_vm7, %v995_v61 }
 0x1fb   : > { %2574 = vmatpush3.bf16.msra.mxu0 %v2773_v62  ;;  %2577 = vmatprep.mubr.msk.bf16.mxu0 %vm2915_vm5, %v2914_v47 }
 0x1fc   : > { %2575 = vmatprep.subr.bf16.mxu0 %v2914_v47 }
 0x1ff   : > { %2576 = vmatpush3.bf16.msra.mxu0 %v2774_v63 }
 0x200   : > { %2589 = vmatprep.subr.bf16.mxu0 %v2914_v47 }
 0x202   : > { %2578 = vmatmul.mubr.msk.bf16.vlgmr.msra.gmra.mrb[8].mxu0 %vm883_vm6, %v3161_v52 }
 0x203   : > { %2591 = vmatprep.mubr.msk.bf16.mxu0 %vm2915_vm5, %v2914_v47 }
 0x2cd   : > { %v3202_v3 = vpop.f32.mrb[4].mxu0 }
 0x2ce   : > { %v2565_v4 = vpop.f32.mrb[5].mxu0  ;;  %v1044_v5 = vsel %vm996_vm7, %v3202_v3, -inf }
 0x2cf   : > { %1045 = vmax.xlane.f32.xlu0 %v1044_v5  ;;  %v1040_v6 = vpop.f32.mrb[6].mxu0 }
 0x2d0   : > { %v2566_v7 = vpop.f32.mrb[7].mxu0 }
 0x2d5   : > { %v1184_v9 = vpop.f32.mrb[8].mxu0 }
 0x2d6   : > { %v1185_v10 = vadd.f32 %v2383_v8, %v1184_v9  ;;  %v2579_v11 = vpop.f32.mrb[9].mxu0 }
 0x2d7   : > { %v1187_v12 = vpop.f32.mrb[10].mxu0 }
 0x2d8   : > { %v1190_v13 = vpack.c.bf16 %v1185_v10, %v1185_v10  ;;  %v2580_v14 = vpop.f32.mrb[11].mxu0  ;;  %v1784_v10 = vld [vmem:[#allocation2 + $0xc] sm:$0xf] }
 0x2da   : > { %v1263_v15 = vsel %vm996_vm7, %v1190_v13, 0 }
 0x2db   : > { %2590 = vmatpush3.bf16.xpose.msra.mxu0 %v1263_v15 }
 0x2dc   : > { %2601 = vmatprep.subr.bf16.mxu0 %v2914_v47 }
 0x2e2   : > { %2592 = vmatmul.mubr.msk.bf16.vlgmr.msra.gmra.mrb[12].mxu0 %vm996_vm7, %v1258_v17 }
 0x2e3   : > { %2602 = vmatpush3.bf16.msra.mxu0 %v2775_v18  ;;  %2605 = vmatprep.mubr.msk.bf16.mxu0 %vm2915_vm5, %v2914_v47  ;;  %v2392_v18 = vld [vmem:[%s3496_s10 + $0x1] ss:$0 sm:$0xff] }
 0x2e4   : > { %2603 = vmatprep.subr.bf16.mxu0 %v2914_v47 }
 0x2e7   : > { %2604 = vmatpush3.bf16.msra.mxu0 %v2776_v19 }
 0x2e8   : > { %2617 = vmatprep.subr.bf16.mxu0 %v2914_v47 }
 0x2ea   : > { %2606 = vmatmul.mubr.msk.bf16.vlgmr.msra.gmra.mrb[16].mxu0 %vm883_vm6, %v3161_v52 }
 0x2eb   : > { %2619 = vmatprep.mubr.msk.bf16.mxu0 %vm2915_vm5, %v2914_v47 }
 0x35c   : > { %v1046_v21 = vpop.xlane.xlu0 %1045 }
 0x35d   : > { %v3229_v22 = vmax.f32 %v3226_v20, %v1046_v21 }
 0x35f   : > { %v1048_v23 = vsub.f32 %v3226_v20, %v3229_v22  ;;  %1124 = vst.msk [vmem:[#allocation3] sm:$0xff] %vm1065_vm8, %v3229_v22  ;;  %1053 = vperm.xlu0 %2769, %v3229_v22  }
 0x3b5   : > { %v3241_v32 = vpop.f32.mrb[12].mxu0 }
 0x3b6   : > { %v2593_v33 = vpop.f32.mrb[13].mxu0  ;;  %v1307_v34 = vsel %vm996_vm7, %v3241_v32, -inf }
 0x3b7   : > { %1308 = vmax.xlane.f32.xlu1 %v1307_v34  ;;  %v1302_v35 = vpop.f32.mrb[14].mxu0  ;;  %v1569_v33 = vld [vmem:[#allocation3 + $0x10] sm:$0xff] }
 0x3b8   : > { %v2594_v36 = vpop.f32.mrb[15].mxu0 }
 0x3bd   : > { %v1447_v38 = vpop.f32.mrb[16].mxu0 }
 0x3be   : > { %v1448_v39 = vadd.f32 %v2403_v37, %v1447_v38  ;;  %v2607_v40 = vpop.f32.mrb[17].mxu0 }
 0x3bf   : > { %v1450_v41 = vpop.f32.mrb[18].mxu0 }
 0x3c0   : > { %v1453_v42 = vpack.c.bf16 %v1448_v39, %v1448_v39  ;;  %v2608_v43 = vpop.f32.mrb[19].mxu0 }
 0x3c1   : > { %v1049_v43 = vmul.f32 1.442695, %v1048_v23  ;;  %v2412_v23 = vld [vmem:[%s3496_s10 + $0x2] ss:$0 sm:$0xff] }
 0x3c2   : > { %v1526_v44 = vsel %vm996_vm7, %v1453_v42, 0 }
 0x3c3   : > { %2618 = vmatpush3.bf16.xpose.msra.mxu0 %v1526_v44 }
 0x3c4   : > { %2629 = vmatprep.subr.bf16.mxu0 %v2914_v47 }
 0x3ca   : > { %2620 = vmatmul.mubr.msk.bf16.vlgmr.msra.gmra.mrb[20].mxu0 %vm996_vm7, %v1521_v45 }
 0x3cb   : > { %2630 = vmatpush3.bf16.msra.mxu0 %v2779_v46  ;;  %2633 = vmatprep.mubr.msk.bf16.mxu0 %vm2915_vm5, %v2914_v47 }
 0x3cc   : > { %2631 = vmatprep.subr.bf16.mxu0 %v2914_v47 }
 0x3cf   : > { %2632 = vmatpush3.bf16.msra.mxu0 %v2780_v48 }
 0x3d0   : > { %2645 = vmatprep.subr.bf16.mxu0 %v2914_v47 }
 0x3d2   : > { %2634 = vmatmul.mubr.msk.bf16.vlgmr.msra.gmra.mrb[24].mxu0 %vm883_vm6, %v3161_v52  ;;  %v2782_v52 = vld [vmem:[%s3492_s6 + $0x18] sm:$0xff]  }
 0x3d3   : > { %2647 = vmatprep.mubr.msk.bf16.mxu0 %vm2915_vm5, %v2914_v47 }
 0x3de   : > { %v1054_v49 = vpop.permute.xlu0 %1053 }
 0x3df   : > { %v1056_v50 = vsub.f32 %v3202_v3, %v1054_v49 }
 0x3e1   : > { %v1057_v51 = vmul.f32 1.442695, %v1056_v50 }
 0x3e3   : > { %2787 = vpow2.f32 %v1057_v51 }
 0x3ed   : > { %v3266_v53 = vpop.eup %2787 }
 0x3ee   : > { %v1074_v55 = vpack.c.bf16 %v3266_v53, %v3266_v53 }
 0x3f0   : > { %2570 = vmatmul.mubr.msk.bf16.vlgmr.msra.gmra.mrb[4].mxu1 %vm996_vm7, %v1074_v55 }
 0x3f1   : > { %2582 = vmatpush3.bf16.msra.mxu1 %v2781_v54  ;;  %2585 = vmatprep.mubr.msk.bf16.mxu1 %vm2915_vm5, %v2914_v47 }
 0x3f2   : > { %2583 = vmatprep.subr.bf16.mxu1 %v2914_v47 }
 0x3f5   : > { %2584 = vmatpush3.bf16.msra.mxu1 %v2782_v52 }
 0x3f6   : > { %2595 = vmatprep.subr.bf16.mxu1 %v2914_v47 }
 0x3f8   : > { %2586 = vmatmul.mubr.msk.bf16.vlgmr.msra.gmra.mrb[8].mxu1 %vm883_vm6, %v3195_v2 }
 0x3f9   : > { %2597 = vmatprep.mubr.msk.bf16.mxu1 %vm2915_vm5, %v2914_v47 }
 0x444   : > { %v1309_v57 = vpop.xlane.xlu1 %1308 }
 0x445   : > { %v3288_v58 = vmax.f32 %v3285_v56, %v1309_v57 }
 0x447   : > { %v1311_v59 = vsub.f32 %v3285_v56, %v3288_v58  ;;  %1387 = vst.msk [vmem:[#allocation3 + $0x8] sm:$0xff] %vm1065_vm8, %v3288_v58  ;;  %1316 = vperm.xlu1 %2770, %v3288_v58   ;;  %v1061_v58 = vsel %vm996_vm7, %v3266_v53, 0.0  ;;  %v2432_v53 = vld [vmem:[%s3496_s10 + $0x3] ss:$0 sm:$0xff] }
 0x49d   : > { %v3295_v60 = vpop.f32.mrb[20].mxu0 }
 0x49e   : > { %v2621_v61 = vpop.f32.mrb[21].mxu0  ;;  %v1570_v62 = vsel %vm996_vm7, %v3295_v60, -inf }
 0x49f   : > { %1571 = vmax.xlane.f32.xlu1 %v1570_v62  ;;  %v1565_v63 = vpop.f32.mrb[22].mxu0 }
 0x4a0   : > { %v2622_v0 = vpop.f32.mrb[23].mxu0 }
 0x4a5   : > { %v1710_v3 = vpop.f32.mrb[24].mxu0 }
 0x4a6   : > { %v1711_v4 = vadd.f32 %v2423_v1, %v1710_v3  ;;  %v2635_v5 = vpop.f32.mrb[25].mxu0 }
 0x4a7   : > { %v1713_v6 = vpop.f32.mrb[26].mxu0  ;;  %v1312_v5 = vmul.f32 1.442695, %v1311_v59 }
 0x4a8   : > { %v1716_v7 = vpack.c.bf16 %v1711_v4, %v1711_v4  ;;  %v2636_v8 = vpop.f32.mrb[27].mxu0  ;;  %v2786_v4 = vld [vmem:[%s3492_s6 + $0x38] sm:$0xff]   ;;  %v1832_v6 = vld [vmem:[#allocation3 + $0x18] sm:$0xff] }
 0x4aa   : > { %v1789_v9 = vsel %vm996_vm7, %v1716_v7, 0 }
 0x4ab   : > { %2646 = vmatpush3.bf16.xpose.msra.mxu0 %v1789_v9  ;;  %v1323_v9 = vld [vmem:[#allocation4 + $0x8] sm:$0xff] }
 0x4b2   : > { %2648 = vmatmul.mubr.msk.bf16.vlgmr.msra.gmra.mrb[28].mxu0 %vm996_vm7, %v1784_v10 }
 0x4c3   : > { %v3304_v11 = vpop.f32.mrb[4].mxu1 }
 0x4c4   : > { %v2571_v12 = vpop.f32.mrb[5].mxu1 }
 0x4c5   : > { %v1119_v13 = vpop.f32.mrb[6].mxu1 }
 0x4c6   : > { %v2572_v14 = vpop.f32.mrb[7].mxu1  ;;  %v1317_v15 = vpop.permute.xlu1 %1316 }
 0x4c7   : > { %v1319_v16 = vsub.f32 %v3241_v32, %v1317_v15  ;;  %v2784_v32 = vld [vmem:[%s3492_s6 + $0x28] sm:$0xff]  }
 0x4c9   : > { %v1320_v17 = vmul.f32 1.442695, %v1319_v16 }
 0x4cb   : > { %2789 = vpow2.f32 %v1320_v17  ;;  %v1250_v19 = vpop.f32.mrb[8].mxu1  ;;  %v1594_v17 = vld [vmem:[#allocation5 + $0x10] sm:$0xff] }
 0x4cc   : > { %v1251_v21 = vadd.f32 %v2392_v18, %v1250_v19  ;;  %v2587_v24 = vpop.f32.mrb[9].mxu1  ;;  %2791 = vpow2.f32 %v1049_v43 }
 0x4cd   : > { %v1253_v25 = vpop.f32.mrb[10].mxu1 }
 0x4ce   : > { %v1256_v26 = vpack.c.bf16 %v1251_v21, %v1251_v21  ;;  %v2588_v27 = vpop.f32.mrb[11].mxu1 }
 0x4d0   : > { %v1343_v28 = vsel %vm1078_vm9, %v1256_v26, 0 }
 0x4d1   : > { %2596 = vmatpush3.bf16.msra.mxu1 %v1343_v28 }
 0x4d2   : > { %2609 = vmatprep.subr.bf16.mxu1 %v2914_v47 }
 0x4d5   : > { %v2790_v29 = vpop.eup %2789 }
 0x4d6   : > { %v1338_v31 = vpack.c.bf16 %v2790_v29, %v2790_v29  ;;  %v1325_v42 = vsel %vm996_vm7, %v2790_v29, 0.0  ;;  %v3336_v45 = vpop.eup %2791 }
 0x4d8   : > { %2598 = vmatmul.mubr.msk.bf16.vlgmr.msra.gmra.mrb[12].mxu1 %vm996_vm7, %v1338_v31 }
 0x4d9   : > { %2610 = vmatpush3.bf16.msra.mxu1 %v2783_v30  ;;  %2613 = vmatprep.mubr.msk.bf16.mxu1 %vm2915_vm5, %v2914_v47 }
 0x4da   : > { %2611 = vmatprep.subr.bf16.mxu1 %v2914_v47 }
 0x4dd   : > { %2612 = vmatpush3.bf16.msra.mxu1 %v2784_v32 }
 0x4de   : > { %2623 = vmatprep.subr.bf16.mxu1 %v2914_v47 }
 0x4e0   : > { %2614 = vmatmul.mubr.msk.bf16.vlgmr.msra.gmra.mrb[16].mxu1 %vm883_vm6, %v3195_v2 }
 0x4e1   : > { %2625 = vmatprep.mubr.msk.bf16.mxu1 %vm2915_vm5, %v2914_v47 }
 0x52c   : > { %v1572_v34 = vpop.xlane.xlu1 %1571 }
 0x52d   : > { %v1573_v35 = vmax.f32 %v1569_v33, %v1572_v34 }
 0x52f   : > { %v1574_v36 = vsub.f32 %v1569_v33, %v1573_v35  ;;  %1650 = vst.msk [vmem:[#allocation3 + $0x10] sm:$0xff] %vm1065_vm8, %v1573_v35  ;;  %1579 = vperm.xlu0 %2769, %v1573_v35  }
 0x531   : > { %v1575_v44 = vmul.f32 1.442695, %v1574_v36 }
 0x533   : > { %2793 = vpow2.f32 %v1575_v44 }
 0x53d   : > { %v3339_v46 = vpop.eup %2793 }
 0x585   : > { %v3328_v37 = vpop.f32.mrb[28].mxu0 }
 0x586   : > { %v2649_v38 = vpop.f32.mrb[29].mxu0  ;;  %v1833_v39 = vsel %vm996_vm7, %v3328_v37, -inf }
 0x587   : > { %1834 = vmax.xlane.f32.xlu0 %v1833_v39  ;;  %v1828_v40 = vpop.f32.mrb[30].mxu0 }
 0x588   : > { %v2650_v41 = vpop.f32.mrb[31].mxu0 }
 0x58b   : > { %1326 = vadd.xlane.f32.xlu0 %v1325_v42  ;;  %v1059_v42 = vld [vmem:[#allocation4] sm:$0xff] }
 0x58c   : > { %v1060_v43 = vmul.f32 %v3336_v45, %v1059_v42 }
 0x5a1   : > { %1070 = vperm.xlu0 %2769, %v3336_v45  }
 0x5a5   : > { %1597 = vperm.xlu0 %2769, %v3339_v46  }
 0x5ab   : > { %v3342_v48 = vpop.f32.mrb[12].mxu1 }
 0x5ac   : > { %v2599_v49 = vpop.f32.mrb[13].mxu1 }
 0x5ad   : > { %v1382_v50 = vpop.f32.mrb[14].mxu1 }
 0x5ae   : > { %v2600_v51 = vpop.f32.mrb[15].mxu1  ;;  %v1580_v54 = vpop.permute.xlu0 %1579  ;;  %v1331_v50 = vld [vmem:[#allocation5 + $0x8] sm:$0xff] }
 0x5af   : > { %v1582_v20 = vsub.f32 %v3295_v60, %v1580_v54  ;;  %v2785_v60 = vld [vmem:[%s3492_s6 + $0x30] sm:$0xff]  }
 0x5b1   : > { %v1583_v22 = vmul.f32 1.442695, %v1582_v20 }
 0x5b3   : > { %2795 = vpow2.f32 %v1583_v22  ;;  %v1513_v55 = vpop.f32.mrb[16].mxu1  ;;  %v1586_v22 = vld [vmem:[#allocation4 + $0x10] sm:$0xff] }
 0x5b4   : > { %v1514_v52 = vadd.f32 %v2412_v23, %v1513_v55  ;;  %v2615_v57 = vpop.f32.mrb[17].mxu1  ;;  %2797 = vpow2.f32 %v1312_v5  ;;  %v1587_v23 = vmul.f32 %v3339_v46, %v1586_v22 }
 0x5b5   : > { %v1516_v61 = vpop.f32.mrb[18].mxu1  ;;  %v1849_v57 = vld [vmem:[#allocation4 + $0x18] sm:$0xff] }
 0x5b6   : > { %v1519_v62 = vpack.c.bf16 %v1514_v52, %v1514_v52  ;;  %v2616_v63 = vpop.f32.mrb[19].mxu1 }
 0x5b7   : > { %v1857_v63 = vld [vmem:[#allocation5 + $0x18] sm:$0xff] }
 0x5b8   : > { %v1606_v0 = vsel %vm1078_vm9, %v1519_v62, 0 }
 0x5b9   : > { %2624 = vmatpush3.bf16.msra.mxu1 %v1606_v0 }
 0x5ba   : > { %2637 = vmatprep.subr.bf16.mxu1 %v2914_v47 }
 0x5bd   : > { %v2796_v1 = vpop.eup %2795 }
 0x5be   : > { %v1601_v3 = vpack.c.bf16 %v2796_v1, %v2796_v1  ;;  %v2798_v7 = vpop.eup %2797  ;;  %v1588_v59 = vsel %vm996_vm7, %v2796_v1, 0.0 }
 0x5bf   : > { %v1324_v13 = vmul.f32 %v2798_v7, %v1323_v9 }
 0x5c0   : > { %2626 = vmatmul.mubr.msk.bf16.vlgmr.msra.gmra.mrb[20].mxu1 %vm996_vm7, %v1601_v3 }
 0x5c1   : > { %2638 = vmatpush3.bf16.msra.mxu1 %v2785_v60  ;;  %2641 = vmatprep.mubr.msk.bf16.mxu1 %vm2915_vm5, %v2914_v47 }
 0x5c2   : > { %2639 = vmatprep.subr.bf16.mxu1 %v2914_v47 }
 0x5c5   : > { %2640 = vmatpush3.bf16.msra.mxu1 %v2786_v4 }
 0x5c6   : > { %2651 = vmatprep.subr.bf16.mxu1 %v2914_v47 }
 0x5c8   : > { %2642 = vmatmul.mubr.msk.bf16.vlgmr.msra.gmra.mrb[24].mxu1 %vm883_vm6, %v3195_v2 }
 0x5c9   : > { %2653 = vmatprep.mubr.msk.bf16.mxu1 %vm2915_vm5, %v2914_v47  ;;  %v1067_v47 = vld [vmem:[#allocation5] sm:$0xff] }
 0x614   : > { %v1835_v8 = vpop.xlane.xlu0 %1834 }
 0x615   : > { %v1836_v10 = vmax.f32 %v1832_v6, %v1835_v8  ;;  %v2917_v8 = vmov (!%p2438_p1), 0  }
 0x617   : > { %v1837_v12 = vsub.f32 %v1832_v6, %v1836_v10  ;;  %1913 = vst.msk [vmem:[#allocation3 + $0x18] sm:$0xff] %vm1065_vm8, %v1836_v10  ;;  %1842 = vperm.xlu1 %2770, %v1836_v10  }
 0x618   : > { %v1327_v14 = vpop.xlane.xlu0 %1326 }
 0x619   : > { %v1328_v2 = vadd.f32 %v1327_v14, %v1324_v13  ;;  %v2918_v14 = vmov (!%p2438_p1), 0.0  }
 0x61a   : > { %2657 = vmatprep.subr.bf16.mxu0 (!%p2438_p1), %v2918_v14  ;;  %2659 = vmatprep.mubr.msk.bf16.mxu0 (!%p2438_p1), %vm2919_vm10, %v2918_v14 }
 0x61b   : > { %1329 = vst.msk [vmem:[#allocation4 + $0x8] sm:$0xff] %vm1065_vm8, %v1328_v2 }
 0x620   : > { %v1071_v15 = vpop.permute.xlu0 %1070 }
 0x621   : > { %v1073_v16 = vmul.f32 %v1071_v15, %v1067_v47 }
 0x622   : > { %v1930_v5 = vld [vmem:[#allocation4 + $0x8] sm:$0xff] (!%p2438_p1) }
 0x623   : > { %v1122_v56 = vadd.f32 %v3304_v11, %v1073_v16  ;;  %v1928_v16 = vld [vmem:[%s3493_s7] sm:$0xf] (!%p2438_p1) }
 0x624   : > { %v1598_v18 = vpop.permute.xlu0 %1597 }
 0x625   : > { %1123 = vst.msk [vmem:[#allocation5] sm:$0xff] %vm996_vm7, %v1122_v56  ;;  %v1600_v19 = vmul.f32 %v1598_v18, %v1594_v17  ;;  %v1991_v56 = vsel (!%p2438_p1), %vm1078_vm9, %v1928_v16, 0  ;;  %v2442_v17 = vld [vmem:[%s3493_s7 + $0x8] sm:$0xf] (!%p2438_p1) }
 0x63b   : > { %1062 = vadd.xlane.f32.xlu1 %v1061_v58 }
 0x64c   : > { %1334 = vperm.xlu1 %2770, %v2798_v7  }
 0x650   : > { %2804 = vset.pattern.permute.xlu1 (!%p2438_p1), %v2917_v8 }
 0x670   : > { %1589 = vadd.xlane.f32.xlu1 %v1588_v59 }
 0x693   : > { %v1642_v21 = vpop.f32.mrb[20].mxu1 }
 0x694   : > { %v1648_v24 = vadd.f32 %v1642_v21, %v1600_v19  ;;  %v2627_v25 = vpop.f32.mrb[21].mxu1 }
 0x695   : > { %v1645_v26 = vpop.f32.mrb[22].mxu1 }
 0x696   : > { %1649 = vst.msk [vmem:[#allocation5 + $0x10] sm:$0xff] %vm996_vm7, %v1648_v24  ;;  %v2628_v11 = vpop.f32.mrb[23].mxu1  ;;  %v1843_v27 = vpop.permute.xlu1 %1842  ;;  %v1918_v24 = vld [vmem:[#allocation5] sm:$0xff] (!%p2438_p1)  ;;  %v2049_v26 = vsel (!%p2438_p1), %vm1078_vm9, %v2442_v17, 0 }
 0x697   : > { %v1845_v28 = vsub.f32 %v3328_v37, %v1843_v27  ;;  %v1838_v37 = vmul.f32 1.442695, %v1837_v12  ;;  %v2439_v12 = vld [vmem:[%s3493_s7 + $0x4] sm:$0xf] (!%p2438_p1)  ;;  %v2444_v27 = vld [vmem:[%s3493_s7 + $0xc] sm:$0xf] (!%p2438_p1) }
 0x698   : > { %v1945_v2 = vsel (!%p2438_p1), %vm1078_vm9, %v2439_v12, 0 }
 0x699   : > { %v1846_v29 = vmul.f32 1.442695, %v1845_v28  ;;  %2658 = vmatpush3.bf16.msra.mxu0 (!%p2438_p1), %v1945_v2 }
 0x69a   : > { %2669 = vmatprep.subr.bf16.mxu0 (!%p2438_p1), %v2918_v14 }
 0x69b   : > { %2799 = vpow2.f32 %v1846_v29  ;;  %v1776_v30 = vpop.f32.mrb[24].mxu1 }
 0x69c   : > { %v1777_v31 = vadd.f32 %v2432_v53, %v1776_v30  ;;  %v2643_v32 = vpop.f32.mrb[25].mxu1  ;;  %2801 = vpow2.f32 %v1838_v37  ;;  %v2108_v30 = vsel (!%p2438_p1), %vm1078_vm9, %v2444_v27, 0 }
 0x69d   : > { %v1779_v33 = vpop.f32.mrb[26].mxu1  ;;  %2805 = vrcp.f32 (!%p2438_p1), %v1930_v5  ;;  %v2033_v19 = vld [vmem:[#allocation5 + $0x10] sm:$0xff] (!%p2438_p1) }
 0x69e   : > { %v1782_v34 = vpack.c.bf16 %v1777_v31, %v1777_v31  ;;  %v2644_v35 = vpop.f32.mrb[27].mxu1 }
 0x6a0   : > { %v1869_v36 = vsel %vm1078_vm9, %v1782_v34, 0 }
 0x6a1   : > { %2652 = vmatpush3.bf16.msra.mxu1 %v1869_v36 }
 0x6a2   : > { %2663 = vmatprep.subr.bf16.mxu1 (!%p2438_p1), %v2918_v14 }
 0x6a5   : > { %v2800_v38 = vpop.eup %2799 }
 0x6a6   : > { %v1851_v39 = vsel %vm996_vm7, %v2800_v38, 0.0  ;;  %v1864_v40 = vpack.c.bf16 %v2800_v38, %v2800_v38  ;;  %v2802_v41 = vpop.eup %2801 }
 0x6a7   : > { %1852 = vadd.xlane.f32.xlu0 %v1851_v39  ;;  %v1850_v45 = vmul.f32 %v2802_v41, %v1849_v57  ;;  %v2806_v10 = vpop.eup (!%p2438_p1), %2805 }
 0x6a8   : > { %2654 = vmatmul.mubr.msk.bf16.vlgmr.msra.gmra.mrb[28].mxu1 %vm996_vm7, %v1864_v40 }
 0x6a9   : > { %2665 = vmatprep.mubr.msk.bf16.mxu1 (!%p2438_p1), %vm2919_vm10, %v2918_v14  ;;  %2664 = vmatpush3.bf16.msra.mxu1 (!%p2438_p1), %v1991_v56 }
 0x6aa   : > { %2675 = vmatprep.subr.bf16.mxu1 (!%p2438_p1), %v2918_v14 }
 0x6bd   : > { %1860 = vperm.xlu0 %2769, %v2802_v41  }
 0x6c1   : > { %2803 = vset.pattern.permute.xlu0 (!%p2438_p1), %v2917_v8  ;;  %v2447_v8 = vld [vmem:[%s3532_s22] ss:$0 sm:$0xff] (!%p2438_p1) }
 0x6c2   : > { %1934 = vperm.xlu0 (!%p2438_p1), %2803, %v2806_v10   ;;  %v2448_v10 = vld [vmem:[%s3533_s20] ss:$0 sm:$0xff] (!%p2438_p1) }
 0x6c8   : > { %v1063_v44 = vpop.xlane.xlu1 %1062 }
 0x6c9   : > { %v1064_v49 = vadd.f32 %v1063_v44, %v1060_v43 }
 0x6cb   : > { %1066 = vst.msk [vmem:[#allocation4] sm:$0xff] %vm1065_vm8, %v1064_v49 }
 0x6cc   : > { %v1335_v51 = vpop.permute.xlu1 %1334 }
 0x6cd   : > { %v1337_v54 = vmul.f32 %v1335_v51, %v1331_v50 }
 0x6cf   : > { %v1385_v20 = vadd.f32 %v3342_v48, %v1337_v54 }
 0x6d1   : > { %1386 = vst.msk [vmem:[#allocation5 + $0x8] sm:$0xff] %vm996_vm7, %v1385_v20 }
 0x6d2   : > { %v1919_v7 = vld [vmem:[#allocation4] sm:$0xff] (!%p2438_p1) }
 0x6d8   : > { %v1929_v58 = vld [vmem:[#allocation5 + $0x8] sm:$0xff] (!%p2438_p1) }
 0x6fd   : > { %v1590_v55 = vpop.xlane.xlu1 %1589 }
 0x6fe   : > { %v1591_v52 = vadd.f32 %v1590_v55, %v1587_v23  ;;  %v2151_v23 = vld [vmem:[%s3077_s15] sm:$0xff] (!%p2438_p1) }
 0x700   : > { %1592 = vst.msk [vmem:[#allocation4 + $0x10] sm:$0xff] %vm1065_vm8, %v1591_v52 }
 0x707   : > { %v2034_v6 = vld [vmem:[#allocation4 + $0x10] sm:$0xff] (!%p2438_p1) }
 0x708   : > { %2807 = vrcp.f32 (!%p2438_p1), %v2034_v6 }
 0x709   : > { %2809 = vrcp.f32 (!%p2438_p1), %v1919_v7 }
 0x712   : > { %v2808_v13 = vpop.eup (!%p2438_p1), %2807 }
 0x713   : > { %v2810_v47 = vpop.eup (!%p2438_p1), %2809  ;;  %2038 = vperm.xlu1 (!%p2438_p1), %2804, %v2808_v13  }
 0x714   : > { %1923 = vperm.xlu0 (!%p2438_p1), %2803, %v2810_v47  }
 0x734   : > { %v1853_v61 = vpop.xlane.xlu0 %1852 }
 0x735   : > { %v1854_v62 = vadd.f32 %v1853_v61, %v1850_v45  ;;  %v2446_v45 = vld [vmem:[%s3497_s11] ss:$0 sm:$0xff] (!%p2438_p1) }
 0x737   : > { %1855 = vst.msk [vmem:[#allocation4 + $0x18] sm:$0xff] %vm1065_vm8, %v1854_v62 }
 0x73c   : > { %v1861_v0 = vpop.permute.xlu0 %1860 }
 0x73d   : > { %v1863_v1 = vmul.f32 %v1861_v0, %v1857_v63 }
 0x73e   : > { %v2093_v9 = vld [vmem:[#allocation4 + $0x18] sm:$0xff] (!%p2438_p1) }
 0x73f   : > { %2811 = vrcp.f32 (!%p2438_p1), %v2093_v9 }
 0x741   : > { %v1935_v59 = vpop.permute.xlu0 (!%p2438_p1), %1934 }
 0x742   : > { %v1937_v18 = vmul.f32 (!%p2438_p1), %v1935_v59, %v1929_v58 }
 0x744   : > { %v1938_v25 = vpack.c.bf16 (!%p2438_p1), %v1937_v18, %v1937_v18 }
 0x746   : > { %2660 = vmatmul.mubr.msk.bf16.vlgmr.msra.gmra.mrb[0].mxu0 (!%p2438_p1), %vm996_vm7, %v1938_v25 }
 0x747   : > { %2670 = vmatpush3.bf16.msra.mxu0 (!%p2438_p1), %v2049_v26  ;;  %2671 = vmatprep.mubr.msk.bf16.mxu0 (!%p2438_p1), %vm2919_vm10, %v2918_v14 }
 0x749   : > { %v2812_v15 = vpop.eup (!%p2438_p1), %2811 }
 0x74a   : > { %2097 = vperm.xlu1 (!%p2438_p1), %2804, %v2812_v15  }
 0x778   : > { %1917 = sbr.rel (%p2438_p1) target bundleno = 2530 (0x9e2), region = 84 }
 0x77b   : > { %v1905_v60 = vpop.f32.mrb[28].mxu1 }
 0x77c   : > { %v1911_v48 = vadd.f32 %v1905_v60, %v1863_v1  ;;  %v2655_v3 = vpop.f32.mrb[29].mxu1 }
 0x77d   : > { %v1908_v4 = vpop.f32.mrb[30].mxu1 }
 0x77e   : > { %1912 = vst.msk [vmem:[#allocation5 + $0x18] sm:$0xff] %vm996_vm7, %v1911_v48  ;;  %v2656_v46 = vpop.f32.mrb[31].mxu1 }
 0x785   : > { %v2092_v31 = vld [vmem:[#allocation5 + $0x18] sm:$0xff] }
 0x792   : > { %v2039_v21 = vpop.permute.xlu1 %2038 }
 0x793   : > { %v1924_v11 = vpop.permute.xlu0 %1923  ;;  %v2041_v28 = vmul.f32 %v2039_v21, %v2033_v19 }
 0x794   : > { %v1926_v29 = vmul.f32 %v1924_v11, %v1918_v24 }
 0x795   : > { %v2042_v33 = vpack.c.bf16 %v2041_v28, %v2041_v28 }
 0x796   : > { %v1927_v53 = vpack.c.bf16 %v1926_v29, %v1926_v29 }
 0x797   : > { %2672 = vmatmul.mubr.msk.bf16.vlgmr.msra.gmra.mrb[4].mxu0 %vm996_vm7, %v2042_v33 }
 0x798   : > { %2666 = vmatmul.mubr.msk.bf16.vlgmr.msra.gmra.mrb[0].mxu1 %vm996_vm7, %v1927_v53 }
 0x799   : > { %2676 = vmatpush3.bf16.msra.mxu1 %v2108_v30  ;;  %2677 = vmatprep.mubr.msk.bf16.mxu1 %vm2919_vm10, %v2918_v14 }
 0x7c9   : > { %v2098_v32 = vpop.permute.xlu1 %2097 }
 0x7ca   : > { %v2100_v34 = vmul.f32 %v2098_v32, %v2092_v31 }
 0x7cc   : > { %v2101_v35 = vpack.c.bf16 %v2100_v34, %v2100_v34 }
 0x7ce   : > { %2678 = vmatmul.mubr.msk.bf16.vlgmr.msra.gmra.mrb[4].mxu1 %vm996_vm7, %v2101_v35 }
 0x819   : > { %v1981_v36 = vpop.f32.mrb[0].mxu0 }
 0x81a   : > { %v2661_v38 = vpop.f32.mrb[1].mxu0 }
 0x81b   : > { %v1984_v39 = vpop.f32.mrb[2].mxu0 }
 0x81c   : > { %v2662_v40 = vpop.f32.mrb[3].mxu0 }
 0x86a   : > { %v2085_v49 = vpop.f32.mrb[4].mxu0 }
 0x86b   : > { %v2027_v37 = vpop.f32.mrb[0].mxu1  ;;  %v2673_v51 = vpop.f32.mrb[5].mxu0 }
 0x86c   : > { %v2028_v41 = vadd.f32 %v2027_v37, %v1981_v36  ;;  %v2667_v42 = vpop.f32.mrb[1].mxu1  ;;  %v2088_v54 = vpop.f32.mrb[6].mxu0 }
 0x86d   : > { %v2030_v43 = vpop.f32.mrb[2].mxu1  ;;  %v2674_v20 = vpop.f32.mrb[7].mxu0 }
 0x86e   : > { %v2668_v44 = vpop.f32.mrb[3].mxu1  ;;  %v2091_v50 = vadd.f32 %v2085_v49, %v2028_v41 }
 0x8a1   : > { %v2144_v22 = vpop.f32.mrb[4].mxu1 }
 0x8a2   : > { %v2150_v55 = vadd.f32 %v2144_v22, %v2091_v50  ;;  %v2679_v52 = vpop.f32.mrb[5].mxu1 }
 0x8a3   : > { %v2147_v57 = vpop.f32.mrb[6].mxu1 }
 0x8a4   : > { %v2152_v61 = vadd.f32 %v2151_v23, %v2150_v55  ;;  %v2680_v62 = vpop.f32.mrb[7].mxu1 }
 0x8a6   : > { %v2160_v63 = vadd.f32 %v2446_v45, %v2152_v61 }
 0x8a8   : > { %v2161_v0 = vsel %vm883_vm6, %v2160_v63, 0.0 }
 0x8a9   : > { %2162 = vadd.xlane.f32.xlu0 %v2161_v0 }
 0x936   : > { %v2163_v1 = vpop.xlane.xlu0 %2162 }
 0x937   : > { %v2165_v60 = vmul.f32 0.03125, %v2163_v1 }
 0x939   : > { %v2166_v48 = vsub.f32 %v2160_v63, %v2165_v60 }
 0x93b   : > { %v2167_v3 = vmul.f32 %v2166_v48, %v2166_v48 }
 0x93d   : > { %v2168_v4 = vsel %vm883_vm6, %v2167_v3, 0.0 }
 0x93e   : > { %2169 = vadd.xlane.f32.xlu1 %v2168_v4 }
 0x9cb   : > { %v2170_v46 = vpop.xlane.xlu1 %2169 }
 0x9cc   : > { %v2171_v5 = vmul.f32 0.03125, %v2170_v46 }
 0x9ce   : > { %v2172_v6 = vadd.f32 1e-05, %v2171_v5 }
 0x9d0   : > { %2813 = vrsqrt.f32 %v2172_v6 }
 0x9da   : > { %v2814_v7 = vpop.eup %2813 }
 0x9db   : > { %v2174_v9 = vmul.f32 %v2814_v7, %v2166_v48 }
 0x9dd   : > { %v2182_v12 = vmul.f32 %v2447_v8, %v2174_v9 }
 0x9df   : > { %v2190_v13 = vadd.f32 %v2448_v10, %v2182_v12 }
 0x9e1   : > { %2191 = vst.msk [vmem:[%s529_s21] sm:$0xff] %vm883_vm6, %v2190_v13 }
 0x9e2 PF: > { %s3534_s12 = sld [smem:[#allocation12_spill]]  ;;  %s3537_s30 = sld [smem:[#allocation23_spill]] }
 0x9e3   : > { %s3535_s14 = sld [smem:[#allocation10_spill]]  ;;  %s2206_s19 = sshll.u32 %s529_s21, 4  ;;  %s2207_s19 = int_to_ptr.vmem [resolvable:$true] %s2206_s19 }
 0x9e4   : > { %s2815_s26 = scalar_lea.vmem %s2207_s19, 128  ;;  %s2920_s22 = smov [#allocation6]  }
 0x9e5   : > { %p2816_p2 = scmp.ne.s32.totalorder %s2207_s19, %s2815_s26  ;;  %s2819_s27 = sshll.u32 %s2920_s22, 4  ;;  %s2820_s27 = int_to_ptr.vmem [resolvable:$false] %s2819_s27 }
 0x9e6   : > { %s2821_s28 = scalar_lea.vmem %s2820_s27, 256  ;;  %p2822_p6 = scmp.lt.s32.totalorder %s2207_s19, %s2820_s27 }
 0x9e7   : > { %p2817_p4 = pnand %p2816_p2, %p3045_p3  ;;  %p2823_p7 = scmp.lt.s32.totalorder %s2821_s28, %s2815_s26 }
 0x9e8   : > { %s2450_s16 = sshll.u32 %s3534_s12, 7  ;;  %s3538_s24 = smov %s3537_s30 }
 0x9e9   : > { %s3435_s17 = scalar_lea.hbm %s3537_s30, %s2450_s16  ;;  %s3539_s25 = sand.u32 1, %s3535_s14  }
 0x9ea   : > { %s2193_s15 = scalar_lea.sflag [#allocation7], %s3539_s25  ;;  %p2818_p5 = pneg %p2817_p4 }
 0x9eb   : > { %p2824_p8 = por %p2823_p7, %p2822_p6 }
 0x9ed   : > { %p2825_p10 = pnand %p2824_p8, %p2818_p5 }
 0x9ef   : > { %2828 = shalt.err (!%p2825_p10)
}
 0x9f0   : > { %s2829_s23 = scalar_lea.hbm %s3435_s17, 128  ;;  %s2833_s12 = scalar_lea.hbm %s3538_s24, 256 }
 0x9f1   : > { %p2830_p11 = scmp.ne.s32.totalorder %s3435_s17, %s2829_s23  ;;  %p2834_p0 = scmp.lt.u32.totalorder %s3435_s17, %s3538_s24 }
 0x9f2   : > { %p2835_p1 = scmp.lt.u32.totalorder %s2833_s12, %s2829_s23  ;;  %p2837_p4 = scmp.lt.u32.totalorder %s2829_s23, %s3435_s17 }
 0x9f3   : > { %p2831_p12 = pnand %p2830_p11, %p3045_p3 }
 0x9f4   : > { %p2836_p2 = por %p2835_p1, %p2834_p0 }
 0x9f5   : > { %p2832_p13 = pneg %p2831_p12 }
 0x9f6   : > { %p2838_p5 = por %p2837_p4, %p2836_p2 }
 0x9f8   : > { %p2839_p6 = pnand %p2838_p5, %p2832_p13 }
 0x9fa   : > { %2842 = shalt.err (!%p2839_p6)
}
 0x9fb   : > { %2681 = dma.vmem_to_hbm [thread:$0]  (%p3045_p3), %s2207_s19, 128, %s3435_s17, %s2193_s15  }
 0x9fc PF: > { %s3540_s18 = sld [smem:[#allocation15_spill]]  ;;  %s3541_s29 = sld [smem:[#allocation9_spill]] }
 0xa02   : > { %p2687_p7 = scmp.ge.s32.totalorder %s3540_s18, 2  ;;  %s2218_s25 = sand.u32 1, %s3541_s29  }
 0xa03   : > { %s2219_s26 = scalar_lea.sflag [#allocation7], %s2218_s25 }
 0xa04   : > { %p2684_p8 = pnand %p2687_p7, %p3055_p9 }
 0xa06   : > { %2876 = dma.done.wait (!%p2684_p8), %s2219_s26, 128  }
 0xa07   : > { %2878 = vsyncadd (!%p2684_p8), %s2219_s26, 4294967168  ;;  %s27_s20 = sadd.s32 1, %s3540_s18   ;;  %s3543_s29 = sld [smem:[#allocation10_spill]] }
 0xa08   : > { %p24_p10 = scmp.ge.s32.totalorder %s27_s20, 6   ;;  %s3544_s30 = sld [smem:[#allocation11_spill]] }
 0xa09   : > { %s3545_s15 = sld [smem:[#allocation20_spill]]  ;;  %s3546_s16 = sld [smem:[#allocation13_spill]] }
 0xa0a   : > { %s3547_s17 = sld [smem:[#allocation14_spill]]  ;;  %s3548_s18 = sld [smem:[#allocation16_spill]] }
 0xa0b   : > { %s3549_s19 = sld [smem:[#allocation18_spill]]  ;;  %26 = sbr.rel (!%p24_p10) target bundleno = 9 (0x9), region = 164 }
 0xa12   :  { %2224 = vsyncpa [#allocation7], 1 }
 0xa13   :  { %2226 = vsyncpa [#allocation7 + $0x1], 1 }

</bundles_post_ra>
